<compile_context>
chip_gen: v7x
topology: tpu7x:2x2x1
jax: 0.10.0
libtpu: 0.0.40
codegen_flags: <defaults>
</compile_context>

<pallas_src>
import numpy as np
import jax
import jax.numpy as jnp
from jax.experimental import pallas as pl
from jax.experimental.pallas import tpu as pltpu

EPS = 1e-6
NEG_INF = -1e9


# ------------------------------ kernel ------------------------------------ #

def _layer_norm(x, g, b):
    mean = jnp.mean(x, axis=-1, keepdims=True)
    var = jnp.mean((x - mean) ** 2, axis=-1, keepdims=True)
    return (x - mean) * jax.lax.rsqrt(var + EPS) * g + b


def fused_encoder_kernel(scale_ref, src_ref, pos_ref, eg_ref, eb_ref, bias_ref,
                         wq_ref, wk_ref, wv_ref, wfc_ref,
                         ln1g_ref, ln1b_ref,
                         w1_ref, fb1_ref, w2_ref, fb2_ref,
                         ln2g_ref, ln2b_ref,
                         o_ref, x_scr):
    """One grid step == one EncoderLayer over the whole batch.

    Grid axis 0 iterates layers; the activation (B*L, D) lives in VMEM scratch
    for the whole pass.  At layer 0 the positional encoding + encoder-top
    LayerNorm are applied first; at the last layer the result is stored.
    """
    layer = pl.program_id(0)

    # ---- layer 0 only: x = LayerNorm(src + pos_enc) ------------------------
    @pl.when(layer == 0)
    def _():
        x0 = src_ref[...] + pos_ref[...]
        x_scr[...] = _layer_norm(x0, eg_ref[...], eb_ref[...])

    x = x_scr[...]                                     # (N, D), N = B*L
    n_head = wq_ref.shape[1]
    n_rows, d_model = x.shape

    # ---- multi-head self-attention: heads batched in one dot_general chain -
    wq = wq_ref[0]                                     # (H, D, d_k)
    wk = wk_ref[0]                                     # (H, D, d_k)
    wv = wv_ref[0]                                     # (H, D, d_v)
    wfc = wfc_ref[0]                                   # (H, d_v, D)

    xh = jnp.broadcast_to(x[None], (n_head, n_rows, d_model))
    q = jnp.einsum('hnd,hdk->hnk', xh, wq, preferred_element_type=jnp.float32)
    k = jnp.einsum('hnd,hdk->hnk', xh, wk, preferred_element_type=jnp.float32)
    v = jnp.einsum('hnd,hdk->hnk', xh, wv, preferred_element_type=jnp.float32)
    q = q / scale_ref[...]                             # 1/sqrt(d_k), one VPU op

    # Scores over all B*L rows at once; cross-batch entries are pushed to
    # -1e9 by the additive block-diagonal bias, so the fused softmax equals
    # the per-batch softmax exactly.  Contraction on the last dims avoids any
    # explicit transpose of K.
    s = jnp.einsum('hnd,hmd->hnm', q, k, preferred_element_type=jnp.float32)
    s = s + bias_ref[...]                              # (H,N,N) + (N,N)
    s = s - jnp.max(s, axis=-1, keepdims=True)
    p = jnp.exp(s)
    p = p * pl.reciprocal(jnp.sum(p, axis=-1, keepdims=True))  # exact recip
    ctx = jnp.einsum('hnm,hmd->hnd', p, v, preferred_element_type=jnp.float32)

    # Per-head output projection + sum over heads == concat(heads) @ W_fc,
    # without any lane-dim concatenation.
    attn = jnp.einsum('hnd,hde->hne', ctx, wfc, preferred_element_type=jnp.float32)
    attn = jnp.sum(attn, axis=0)                       # (N, D)

    x1 = _layer_norm(attn + x, ln1g_ref[0], ln1b_ref[0])

    # ---- position-wise feed-forward ----------------------------------------
    hid = jnp.dot(x1, w1_ref[0], preferred_element_type=jnp.float32) + fb1_ref[0]
    hid = jnp.maximum(hid, 0.0)
    ffn = jnp.dot(hid, w2_ref[0], preferred_element_type=jnp.float32) + fb2_ref[0]

    x_new = _layer_norm(ffn + x1, ln2g_ref[0], ln2b_ref[0])
    x_scr[...] = x_new                                 # carry to next layer

    @pl.when(layer == pl.num_programs(0) - 1)
    def _():
        o_ref[...] = x_new


# ------------------------------ wrapper ------------------------------------ #

def transformer_forward(src_seq, trg_seq, params, n_head, d_k, d_v):
    """Matches Transformer.forward: runs only the encoder, src_mask=None."""
    del trg_seq  # accepted but unused, exactly like the PyTorch forward
    B, L, D = src_seq.shape
    layers = params["layers"]
    n_layers = len(layers)
    d_inner = layers[0]["w1"].shape[1]
    N = B * L
    H = n_head

    def stack(name):
        return jnp.stack([p[name] for p in layers], axis=0)

    # Split the head dim out of the projection weights so the kernel can batch
    # all heads in one dot_general (layout: [layer, head, in, out]).
    wq = stack("wq").reshape(n_layers, D, H, d_k).transpose(0, 2, 1, 3)
    wk = stack("wk").reshape(n_layers, D, H, d_k).transpose(0, 2, 1, 3)
    wv = stack("wv").reshape(n_layers, D, H, d_v).transpose(0, 2, 1, 3)
    wfc = stack("wfc").reshape(n_layers, H, d_v, D)
    ln1_g, ln1_b = stack("ln1_g"), stack("ln1_b")
    w1, b1 = stack("w1"), stack("b1")
    w2, b2 = stack("w2"), stack("b2")
    ln2_g, ln2_b = stack("ln2_g"), stack("ln2_b")

    # Flatten (B, L) -> rows so every matmul sees all B*L rows per grid step.
    src2 = src_seq.reshape(N, D)
    pos2 = jnp.tile(params["pos_table"][:L], (B, 1))            # (N, D)
    scale = jnp.full((1, 1), float(d_k) ** 0.5, jnp.float32)    # softmax temp

    # Additive block-diagonal bias: rows/cols from different batch elements
    # get -1e9, so attention never mixes batch elements.
    batch_id = jnp.arange(N, dtype=jnp.int32) // L
    attn_bias = jnp.where(batch_id[:, None] == batch_id[None, :],
                          0.0, NEG_INF).astype(jnp.float32)

    def const_spec(shape):
        return pl.BlockSpec(shape, lambda l, _n=len(shape): (0,) * _n)

    def layer_spec(shape):
        return pl.BlockSpec((1,) + shape,
                            lambda l, _n=len(shape): (l,) + (0,) * _n)

    out2 = pl.pallas_call(
        fused_encoder_kernel,
        out_shape=jax.ShapeDtypeStruct((N, D), jnp.float32),
        grid=(n_layers,),
        in_specs=[
            const_spec((1, 1)),                  # softmax temperature
            const_spec((N, D)),                  # embedded src rows
            const_spec((N, D)),                  # positional encoding rows
            const_spec((1, D)),                  # encoder-top LN gamma
            const_spec((1, D)),                  # encoder-top LN beta
            const_spec((N, N)),                  # block-diagonal attn bias
            layer_spec((H, D, d_k)),             # W_q   (per head)
            layer_spec((H, D, d_k)),             # W_k   (per head)
            layer_spec((H, D, d_v)),             # W_v   (per head)
            layer_spec((H, d_v, D)),             # W_fc  (per head)
            layer_spec((1, D)), layer_spec((1, D)),           # LN1 gamma/beta
            layer_spec((D, d_inner)), layer_spec((1, d_inner)),  # FFN w1/b1
            layer_spec((d_inner, D)), layer_spec((1, D)),        # FFN w2/b2
            layer_spec((1, D)), layer_spec((1, D)),           # LN2 gamma/beta
        ],
        out_specs=pl.BlockSpec((N, D), lambda l: (0, 0)),
        scratch_shapes=[pltpu.VMEM((N, D), jnp.float32)],     # carried x
        compiler_params=pltpu.CompilerParams(
            dimension_semantics=("arbitrary",)),  # layer axis carries state
    )(scale, src2, pos2, params["enc_ln_g"], params["enc_ln_b"], attn_bias,
      wq, wk, wv, wfc, ln1_g, ln1_b, w1, b1, w2, b2, ln2_g, ln2_b)

    return out2.reshape(B, L, D)


# ----------------------------- params / reference -------------------------- #

def sinusoid_table(n_position, d_hid):
    pos = np.arange(n_position, dtype=np.float64)[:, None]
    hid = np.arange(d_hid)[None, :]
    angle = pos / np.power(10000.0, 2 * (hid // 2) / d_hid)
    table = np.zeros((n_position, d_hid), dtype=np.float64)
    table[:, 0::2] = np.sin(angle[:, 0::2])
    table[:, 1::2] = np.cos(angle[:, 1::2])
    return jnp.asarray(table, dtype=jnp.float32)


def xavier(key, shape):
    fan_in, fan_out = shape
    limit = float(np.sqrt(6.0 / (fan_in + fan_out)))
    return jax.random.uniform(key, shape, jnp.float32, -limit, limit)


def make_params(key, d_model, d_inner, n_layers, n_head, d_k, d_v, n_position):
    params = {
        "pos_table": sinusoid_table(n_position, d_model),
        "enc_ln_g": jnp.ones((1, d_model), jnp.float32),
        "enc_ln_b": jnp.zeros((1, d_model), jnp.float32),
        "layers": [],
    }
    for _ in range(n_layers):
        key, *ks = jax.random.split(key, 7)
        params["layers"].append({
            "wq": xavier(ks[0], (d_model, n_head * d_k)),
            "wk": xavier(ks[1], (d_model, n_head * d_k)),
            "wv": xavier(ks[2], (d_model, n_head * d_v)),
            "wfc": xavier(ks[3], (n_head * d_v, d_model)),
            "ln1_g": jnp.ones((1, d_model), jnp.float32),
            "ln1_b": jnp.zeros((1, d_model), jnp.float32),
            "w1": xavier(ks[4], (d_model, d_inner)),
            "b1": jnp.zeros((1, d_inner), jnp.float32),
            "w2": xavier(ks[5], (d_inner, d_model)),
            "b2": jnp.zeros((1, d_model), jnp.float32),
            "ln2_g": jnp.ones((1, d_model), jnp.float32),
            "ln2_b": jnp.zeros((1, d_model), jnp.float32),
        })
    return params


def reference_forward(src, params, n_head, d_k, d_v):
    """Plain-JAX reference mirroring the PyTorch forward semantics."""
    def ln(x, g, b):
        m = x.mean(-1, keepdims=True)
        v = ((x - m) ** 2).mean(-1, keepdims=True)
        return (x - m) / jnp.sqrt(v + EPS) * g + b

    B, L, D = src.shape
    x = src + params["pos_table"][None, :L]
    x = ln(x, params["enc_ln_g"], params["enc_ln_b"])
    for p in params["layers"]:
        q = (x @ p["wq"]).reshape(B, L, n_head, d_k).transpose(0, 2, 1, 3)
        k = (x @ p["wk"]).reshape(B, L, n_head, d_k).transpose(0, 2, 1, 3)
        v = (x @ p["wv"]).reshape(B, L, n_head, d_v).transpose(0, 2, 1, 3)
        s = (q / (d_k ** 0.5)) @ k.transpose(0, 1, 3, 2)
        a = jax.nn.softmax(s, axis=-1)
        o = (a @ v).transpose(0, 2, 1, 3).reshape(B, L, n_head * d_v)
        o = o @ p["wfc"]
        x = ln(o + x, p["ln1_g"], p["ln1_b"])
        h = jnp.maximum(x @ p["w1"] + p["b1"], 0.0)
        f = h @ p["w2"] + p["b2"]
        x = ln(f + x, p["ln2_g"], p["ln2_b"])
    return x


# ------------------------------- main -------------------------------------- #

if __name__ == "__main__":
    B, L = 2, 8
    d_model, d_inner = 32, 64
    n_layers, n_head, d_k, d_v = 2, 4, 8, 8
    n_position = 200

    key = jax.random.PRNGKey(0)
    k_param, k_src, k_trg = jax.random.split(key, 3)

    params = make_params(k_param, d_model, d_inner, n_layers, n_head, d_k, d_v,
                         n_position)
    # src_seq: already-embedded float sequence (Encoder.forward adds pos-enc
    # directly to its input); trg_seq: unused by the forward.
    src_seq = jax.random.normal(k_src, (B, L, d_model), jnp.float32)
    trg_seq = jax.random.randint(k_trg, (B, L), 0, 100)

    out = transformer_forward(src_seq, trg_seq, params, n_head, d_k, d_v)
    out = jax.block_until_ready(out)

    ref = reference_forward(src_seq, params, n_head, d_k, d_v)
    assert out.shape == (B, L, d_model)
    # Small tolerance headroom for reassociated f32 accumulations (head-batched
    # output projection + fused softmax); all math stays in f32.
    np.testing.assert_allclose(np.asarray(out), np.asarray(ref),
                               rtol=5e-4, atol=5e-4)
    print("KERNEL_OK")
</pallas_src>

<mosaic_0001>
module attributes {stable_mosaic.version = 11 : i64} {
  func.func @fused_encoder_kernel(%arg0: i32, %arg1: memref<1x1xf32, #tpu.memory_space<vmem>>, %arg2: memref<16x32xf32, #tpu.memory_space<vmem>>, %arg3: memref<16x32xf32, #tpu.memory_space<vmem>>, %arg4: memref<1x32xf32, #tpu.memory_space<vmem>>, %arg5: memref<1x32xf32, #tpu.memory_space<vmem>>, %arg6: memref<16x16xf32, #tpu.memory_space<vmem>>, %arg7: memref<1x4x32x8xf32, #tpu.memory_space<vmem>>, %arg8: memref<1x4x32x8xf32, #tpu.memory_space<vmem>>, %arg9: memref<1x4x32x8xf32, #tpu.memory_space<vmem>>, %arg10: memref<1x4x8x32xf32, #tpu.memory_space<vmem>>, %arg11: memref<1x1x32xf32, #tpu.memory_space<vmem>>, %arg12: memref<1x1x32xf32, #tpu.memory_space<vmem>>, %arg13: memref<1x32x64xf32, #tpu.memory_space<vmem>>, %arg14: memref<1x1x64xf32, #tpu.memory_space<vmem>>, %arg15: memref<1x64x32xf32, #tpu.memory_space<vmem>>, %arg16: memref<1x1x32xf32, #tpu.memory_space<vmem>>, %arg17: memref<1x1x32xf32, #tpu.memory_space<vmem>>, %arg18: memref<1x1x32xf32, #tpu.memory_space<vmem>>, %arg19: memref<16x32xf32, #tpu.memory_space<vmem>>, %arg20: memref<16x32xf32, #tpu.memory_space<vmem>>) attributes {dimension_semantics = [#tpu.dimension_semantics<arbitrary>], iteration_bounds = array<i64: 2>, scalar_prefetch = 0 : i64, scratch_operands = 1 : i64, tpu.core_type = #tpu.core_type<tc>, window_params = [{pipeline_mode = #tpu.pipeline_mode<synchronous>, transform_indices = @transform_0, window_bounds = array<i64: 1, 1>}, {pipeline_mode = #tpu.pipeline_mode<synchronous>, transform_indices = @transform_1, window_bounds = array<i64: 16, 32>}, {pipeline_mode = #tpu.pipeline_mode<synchronous>, transform_indices = @transform_2, window_bounds = array<i64: 16, 32>}, {pipeline_mode = #tpu.pipeline_mode<synchronous>, transform_indices = @transform_3, window_bounds = array<i64: 1, 32>}, {pipeline_mode = #tpu.pipeline_mode<synchronous>, transform_indices = @transform_4, window_bounds = array<i64: 1, 32>}, {pipeline_mode = #tpu.pipeline_mode<synchronous>, transform_indices = @transform_5, window_bounds = array<i64: 16, 16>}, {transform_indices = @transform_6, window_bounds = array<i64: 1, 4, 32, 8>}, {transform_indices = @transform_7, window_bounds = array<i64: 1, 4, 32, 8>}, {transform_indices = @transform_8, window_bounds = array<i64: 1, 4, 32, 8>}, {transform_indices = @transform_9, window_bounds = array<i64: 1, 4, 8, 32>}, {transform_indices = @transform_10, window_bounds = array<i64: 1, 1, 32>}, {transform_indices = @transform_11, window_bounds = array<i64: 1, 1, 32>}, {transform_indices = @transform_12, window_bounds = array<i64: 1, 32, 64>}, {transform_indices = @transform_13, window_bounds = array<i64: 1, 1, 64>}, {transform_indices = @transform_14, window_bounds = array<i64: 1, 64, 32>}, {transform_indices = @transform_15, window_bounds = array<i64: 1, 1, 32>}, {transform_indices = @transform_16, window_bounds = array<i64: 1, 1, 32>}, {transform_indices = @transform_17, window_bounds = array<i64: 1, 1, 32>}, {pipeline_mode = #tpu.pipeline_mode<synchronous>, transform_indices = @transform_18, window_bounds = array<i64: 16, 32>}]} {
    %c0_i32 = arith.constant 0 : i32
    %0 = arith.cmpi eq, %arg0, %c0_i32 : i32
    %1 = arith.extui %0 : i1 to i32
    %c0_i32_0 = arith.constant 0 : i32
    %2 = arith.cmpi ne, %1, %c0_i32_0 : i32
    scf.if %2 {
      %c0_70 = arith.constant 0 : index
      %c0_71 = arith.constant 0 : index
      %114 = vector.load %arg2[%c0_70, %c0_71] : memref<16x32xf32, #tpu.memory_space<vmem>>, vector<16x32xf32>
      %c0_72 = arith.constant 0 : index
      %c0_73 = arith.constant 0 : index
      %115 = vector.load %arg3[%c0_72, %c0_73] : memref<16x32xf32, #tpu.memory_space<vmem>>, vector<16x32xf32>
      %116 = arith.addf %114, %115 : vector<16x32xf32>
      %c0_74 = arith.constant 0 : index
      %c0_75 = arith.constant 0 : index
      %117 = vector.load %arg4[%c0_74, %c0_75] : memref<1x32xf32, #tpu.memory_space<vmem>>, vector<1x32xf32>
      %c0_76 = arith.constant 0 : index
      %c0_77 = arith.constant 0 : index
      %118 = vector.load %arg5[%c0_76, %c0_77] : memref<1x32xf32, #tpu.memory_space<vmem>>, vector<1x32xf32>
      %cst_78 = arith.constant dense<0.000000e+00> : vector<16xf32>
      %119 = vector.multi_reduction <add>, %116, %cst_78 [1] : vector<16x32xf32> to vector<16xf32>
      %120 = vector.shape_cast %119 : vector<16xf32> to vector<16x1xf32>
      %cst_79 = arith.constant 3.200000e+01 : f32
      %121 = vector.broadcast %cst_79 : f32 to vector<16x1xf32>
      %122 = arith.divf %120, %121 : vector<16x1xf32>
      %123 = vector.broadcast %122 : vector<16x1xf32> to vector<16x32xf32>
      %124 = arith.subf %116, %123 : vector<16x32xf32>
      %125 = arith.mulf %124, %124 : vector<16x32xf32>
      %cst_80 = arith.constant dense<0.000000e+00> : vector<16xf32>
      %126 = vector.multi_reduction <add>, %125, %cst_80 [1] : vector<16x32xf32> to vector<16xf32>
      %127 = vector.shape_cast %126 : vector<16xf32> to vector<16x1xf32>
      %cst_81 = arith.constant 3.200000e+01 : f32
      %128 = vector.broadcast %cst_81 : f32 to vector<16x1xf32>
      %129 = arith.divf %127, %128 : vector<16x1xf32>
      %130 = vector.broadcast %122 : vector<16x1xf32> to vector<16x32xf32>
      %131 = arith.subf %116, %130 : vector<16x32xf32>
      %cst_82 = arith.constant 9.99999997E-7 : f32
      %132 = vector.broadcast %cst_82 : f32 to vector<16x1xf32>
      %133 = arith.addf %129, %132 : vector<16x1xf32>
      %134 = math.rsqrt %133 : vector<16x1xf32>
      %135 = vector.broadcast %134 : vector<16x1xf32> to vector<16x32xf32>
      %136 = arith.mulf %131, %135 : vector<16x32xf32>
      %137 = vector.broadcast %117 : vector<1x32xf32> to vector<16x32xf32>
      %138 = arith.mulf %136, %137 : vector<16x32xf32>
      %139 = vector.broadcast %118 : vector<1x32xf32> to vector<16x32xf32>
      %140 = arith.addf %138, %139 : vector<16x32xf32>
      %c0_83 = arith.constant 0 : index
      %c0_84 = arith.constant 0 : index
      %141 = vector.load %arg20[%c0_83, %c0_84] : memref<16x32xf32, #tpu.memory_space<vmem>>, vector<16x32xf32>
      tpu.vector_store %arg20[%c0_83, %c0_84], %140 {strides = array<i32>} : memref<16x32xf32, #tpu.memory_space<vmem>>, vector<16x32xf32>,
    } else {
    }
    %c0 = arith.constant 0 : index
    %c0_1 = arith.constant 0 : index
    %3 = vector.load %arg20[%c0, %c0_1] : memref<16x32xf32, #tpu.memory_space<vmem>>, vector<16x32xf32>
    %c0_2 = arith.constant 0 : index
    %c0_3 = arith.constant 0 : index
    %c0_4 = arith.constant 0 : index
    %c0_5 = arith.constant 0 : index
    %4 = vector.load %arg7[%c0_2, %c0_3, %c0_4, %c0_5] : memref<1x4x32x8xf32, #tpu.memory_space<vmem>>, vector<1x4x32x8xf32>
    %5 = vector.shape_cast %4 : vector<1x4x32x8xf32> to vector<4x32x8xf32>
    %c0_6 = arith.constant 0 : index
    %c0_7 = arith.constant 0 : index
    %c0_8 = arith.constant 0 : index
    %c0_9 = arith.constant 0 : index
    %6 = vector.load %arg8[%c0_6, %c0_7, %c0_8, %c0_9] : memref<1x4x32x8xf32, #tpu.memory_space<vmem>>, vector<1x4x32x8xf32>
    %7 = vector.shape_cast %6 : vector<1x4x32x8xf32> to vector<4x32x8xf32>
    %c0_10 = arith.constant 0 : index
    %c0_11 = arith.constant 0 : index
    %c0_12 = arith.constant 0 : index
    %c0_13 = arith.constant 0 : index
    %8 = vector.load %arg9[%c0_10, %c0_11, %c0_12, %c0_13] : memref<1x4x32x8xf32, #tpu.memory_space<vmem>>, vector<1x4x32x8xf32>
    %9 = vector.shape_cast %8 : vector<1x4x32x8xf32> to vector<4x32x8xf32>
    %c0_14 = arith.constant 0 : index
    %c0_15 = arith.constant 0 : index
    %c0_16 = arith.constant 0 : index
    %c0_17 = arith.constant 0 : index
    %10 = vector.load %arg10[%c0_14, %c0_15, %c0_16, %c0_17] : memref<1x4x8x32xf32, #tpu.memory_space<vmem>>, vector<1x4x8x32xf32>
    %11 = vector.shape_cast %10 : vector<1x4x8x32xf32> to vector<4x8x32xf32>
    %12 = vector.shape_cast %3 : vector<16x32xf32> to vector<1x16x32xf32>
    %13 = vector.shape_cast %12 : vector<1x16x32xf32> to vector<1x16x32xf32>
    %14 = vector.broadcast %13 : vector<1x16x32xf32> to vector<4x16x32xf32>
    "tpu.trace_start"() <{level = 10 : i32, message = "hnd,hdk->hnk"}> : () -> ()
    %cst = arith.constant dense<0.000000e+00> : vector<4x16x8xf32>
    %15 = tpu.matmul %14, %5, %cst {dimension_numbers = #tpu.dot_dimension_numbers<[2], [1], [1], [2], [0, 0, 0, 1, 1, 2], [0], [0]>} : vector<4x16x32xf32>, vector<4x32x8xf32>, vector<4x16x8xf32> -> vector<4x16x8xf32>
    %cst_18 = arith.constant dense<0.000000e+00> : vector<4x16x8xf32>
    %16 = tpu.matmul %14, %7, %cst_18 {dimension_numbers = #tpu.dot_dimension_numbers<[2], [1], [1], [2], [0, 0, 0, 1, 1, 2], [0], [0]>} : vector<4x16x32xf32>, vector<4x32x8xf32>, vector<4x16x8xf32> -> vector<4x16x8xf32>
    %cst_19 = arith.constant dense<0.000000e+00> : vector<4x16x8xf32>
    %17 = tpu.matmul %14, %9, %cst_19 {dimension_numbers = #tpu.dot_dimension_numbers<[2], [1], [1], [2], [0, 0, 0, 1, 1, 2], [0], [0]>} : vector<4x16x32xf32>, vector<4x32x8xf32>, vector<4x16x8xf32> -> vector<4x16x8xf32>
    "tpu.trace_stop"() : () -> ()
    %c0_20 = arith.constant 0 : index
    %c0_21 = arith.constant 0 : index
    %18 = vector.load %arg1[%c0_20, %c0_21] : memref<1x1xf32, #tpu.memory_space<vmem>>, vector<1x1xf32>
    %19 = vector.shape_cast %18 : vector<1x1xf32> to vector<1x1x1xf32>
    %20 = vector.broadcast %19 : vector<1x1x1xf32> to vector<4x16x8xf32>
    %21 = arith.divf %15, %20 : vector<4x16x8xf32>
    "tpu.trace_start"() <{level = 10 : i32, message = "hnd,hmd->hnm"}> : () -> ()
    %cst_22 = arith.constant dense<0.000000e+00> : vector<4x16x16xf32>
    %22 = tpu.matmul %21, %16, %cst_22 {dimension_numbers = #tpu.dot_dimension_numbers<[2], [2], [1], [1], [0, 0, 0, 1, 1, 1], [0], [0]>} : vector<4x16x8xf32>, vector<4x16x8xf32>, vector<4x16x16xf32> -> vector<4x16x16xf32>
    "tpu.trace_stop"() : () -> ()
    %c0_23 = arith.constant 0 : index
    %c0_24 = arith.constant 0 : index
    %23 = vector.load %arg6[%c0_23, %c0_24] : memref<16x16xf32, #tpu.memory_space<vmem>>, vector<16x16xf32>
    %24 = vector.shape_cast %23 : vector<16x16xf32> to vector<1x16x16xf32>
    %25 = vector.broadcast %24 : vector<1x16x16xf32> to vector<4x16x16xf32>
    %26 = arith.addf %22, %25 : vector<4x16x16xf32>
    %cst_25 = arith.constant dense<0xFF800000> : vector<4x16xf32>
    %27 = vector.multi_reduction <maximumf>, %26, %cst_25 [2] : vector<4x16x16xf32> to vector<4x16xf32>
    %28 = vector.shape_cast %27 : vector<4x16xf32> to vector<4x16x1xf32>
    %29 = vector.broadcast %28 : vector<4x16x1xf32> to vector<4x16x16xf32>
    %30 = arith.subf %26, %29 : vector<4x16x16xf32>
    %31 = math.exp %30 : vector<4x16x16xf32>
    %cst_26 = arith.constant dense<0.000000e+00> : vector<4x16xf32>
    %32 = vector.multi_reduction <add>, %31, %cst_26 [2] : vector<4x16x16xf32> to vector<4x16xf32>
    %33 = vector.shape_cast %32 : vector<4x16xf32> to vector<4x16x1xf32>
    %34 = tpu.reciprocal %33 : vector<4x16x1xf32> -> vector<4x16x1xf32>
    %35 = vector.broadcast %34 : vector<4x16x1xf32> to vector<4x16x16xf32>
    %36 = arith.mulf %31, %35 : vector<4x16x16xf32>
    "tpu.trace_start"() <{level = 10 : i32, message = "hnm,hmd->hnd"}> : () -> ()
    %cst_27 = arith.constant dense<0.000000e+00> : vector<4x16x8xf32>
    %37 = tpu.matmul %36, %17, %cst_27 {dimension_numbers = #tpu.dot_dimension_numbers<[2], [1], [1], [2], [0, 0, 0, 1, 1, 2], [0], [0]>} : vector<4x16x16xf32>, vector<4x16x8xf32>, vector<4x16x8xf32> -> vector<4x16x8xf32>
    "tpu.trace_stop"() : () -> ()
    "tpu.trace_start"() <{level = 10 : i32, message = "hnd,hde->hne"}> : () -> ()
    %cst_28 = arith.constant dense<0.000000e+00> : vector<4x16x32xf32>
    %38 = tpu.matmul %37, %11, %cst_28 {dimension_numbers = #tpu.dot_dimension_numbers<[2], [1], [1], [2], [0, 0, 0, 1, 1, 2], [0], [0]>} : vector<4x16x8xf32>, vector<4x8x32xf32>, vector<4x16x32xf32> -> vector<4x16x32xf32>
    "tpu.trace_stop"() : () -> ()
    %cst_29 = arith.constant dense<0.000000e+00> : vector<16x32xf32>
    %39 = vector.multi_reduction <add>, %38, %cst_29 [0] : vector<4x16x32xf32> to vector<16x32xf32>
    %40 = arith.addf %39, %3 : vector<16x32xf32>
    %c0_30 = arith.constant 0 : index
    %c0_31 = arith.constant 0 : index
    %c0_32 = arith.constant 0 : index
    %41 = vector.load %arg11[%c0_30, %c0_31, %c0_32] : memref<1x1x32xf32, #tpu.memory_space<vmem>>, vector<1x1x32xf32>
    %42 = vector.shape_cast %41 : vector<1x1x32xf32> to vector<1x32xf32>
    %c0_33 = arith.constant 0 : index
    %c0_34 = arith.constant 0 : index
    %c0_35 = arith.constant 0 : index
    %43 = vector.load %arg12[%c0_33, %c0_34, %c0_35] : memref<1x1x32xf32, #tpu.memory_space<vmem>>, vector<1x1x32xf32>
    %44 = vector.shape_cast %43 : vector<1x1x32xf32> to vector<1x32xf32>
    %cst_36 = arith.constant dense<0.000000e+00> : vector<16xf32>
    %45 = vector.multi_reduction <add>, %40, %cst_36 [1] : vector<16x32xf32> to vector<16xf32>
    %46 = vector.shape_cast %45 : vector<16xf32> to vector<16x1xf32>
    %cst_37 = arith.constant 3.200000e+01 : f32
    %47 = vector.broadcast %cst_37 : f32 to vector<16x1xf32>
    %48 = arith.divf %46, %47 : vector<16x1xf32>
    %49 = vector.broadcast %48 : vector<16x1xf32> to vector<16x32xf32>
    %50 = arith.subf %40, %49 : vector<16x32xf32>
    %51 = arith.mulf %50, %50 : vector<16x32xf32>
    %cst_38 = arith.constant dense<0.000000e+00> : vector<16xf32>
    %52 = vector.multi_reduction <add>, %51, %cst_38 [1] : vector<16x32xf32> to vector<16xf32>
    %53 = vector.shape_cast %52 : vector<16xf32> to vector<16x1xf32>
    %cst_39 = arith.constant 3.200000e+01 : f32
    %54 = vector.broadcast %cst_39 : f32 to vector<16x1xf32>
    %55 = arith.divf %53, %54 : vector<16x1xf32>
    %56 = vector.broadcast %48 : vector<16x1xf32> to vector<16x32xf32>
    %57 = arith.subf %40, %56 : vector<16x32xf32>
    %cst_40 = arith.constant 9.99999997E-7 : f32
    %58 = vector.broadcast %cst_40 : f32 to vector<16x1xf32>
    %59 = arith.addf %55, %58 : vector<16x1xf32>
    %60 = math.rsqrt %59 : vector<16x1xf32>
    %61 = vector.broadcast %60 : vector<16x1xf32> to vector<16x32xf32>
    %62 = arith.mulf %57, %61 : vector<16x32xf32>
    %63 = vector.broadcast %42 : vector<1x32xf32> to vector<16x32xf32>
    %64 = arith.mulf %62, %63 : vector<16x32xf32>
    %65 = vector.broadcast %44 : vector<1x32xf32> to vector<16x32xf32>
    %66 = arith.addf %64, %65 : vector<16x32xf32>
    %c0_41 = arith.constant 0 : index
    %c0_42 = arith.constant 0 : index
    %c0_43 = arith.constant 0 : index
    %67 = vector.load %arg13[%c0_41, %c0_42, %c0_43] : memref<1x32x64xf32, #tpu.memory_space<vmem>>, vector<1x32x64xf32>
    %68 = vector.shape_cast %67 : vector<1x32x64xf32> to vector<32x64xf32>
    %cst_44 = arith.constant dense<0.000000e+00> : vector<16x64xf32>
    %69 = tpu.matmul %66, %68, %cst_44 {dimension_numbers = #tpu.dot_dimension_numbers<[1], [0], [0], [1], [0, 0, 1, 1], [], []>} : vector<16x32xf32>, vector<32x64xf32>, vector<16x64xf32> -> vector<16x64xf32>
    %c0_45 = arith.constant 0 : index
    %c0_46 = arith.constant 0 : index
    %c0_47 = arith.constant 0 : index
    %70 = vector.load %arg14[%c0_45, %c0_46, %c0_47] : memref<1x1x64xf32, #tpu.memory_space<vmem>>, vector<1x1x64xf32>
    %71 = vector.shape_cast %70 : vector<1x1x64xf32> to vector<1x64xf32>
    %72 = vector.broadcast %71 : vector<1x64xf32> to vector<16x64xf32>
    %73 = arith.addf %69, %72 : vector<16x64xf32>
    %cst_48 = arith.constant 0.000000e+00 : f32
    %74 = vector.broadcast %cst_48 : f32 to vector<16x64xf32>
    %75 = arith.maximumf %73, %74 : vector<16x64xf32>
    %c0_49 = arith.constant 0 : index
    %c0_50 = arith.constant 0 : index
    %c0_51 = arith.constant 0 : index
    %76 = vector.load %arg15[%c0_49, %c0_50, %c0_51] : memref<1x64x32xf32, #tpu.memory_space<vmem>>, vector<1x64x32xf32>
    %77 = vector.shape_cast %76 : vector<1x64x32xf32> to vector<64x32xf32>
    %cst_52 = arith.constant dense<0.000000e+00> : vector<16x32xf32>
    %78 = tpu.matmul %75, %77, %cst_52 {dimension_numbers = #tpu.dot_dimension_numbers<[1], [0], [0], [1], [0, 0, 1, 1], [], []>} : vector<16x64xf32>, vector<64x32xf32>, vector<16x32xf32> -> vector<16x32xf32>
    %c0_53 = arith.constant 0 : index
    %c0_54 = arith.constant 0 : index
    %c0_55 = arith.constant 0 : index
    %79 = vector.load %arg16[%c0_53, %c0_54, %c0_55] : memref<1x1x32xf32, #tpu.memory_space<vmem>>, vector<1x1x32xf32>
    %80 = vector.shape_cast %79 : vector<1x1x32xf32> to vector<1x32xf32>
    %81 = vector.broadcast %80 : vector<1x32xf32> to vector<16x32xf32>
    %82 = arith.addf %78, %81 : vector<16x32xf32>
    %83 = arith.addf %82, %66 : vector<16x32xf32>
    %c0_56 = arith.constant 0 : index
    %c0_57 = arith.constant 0 : index
    %c0_58 = arith.constant 0 : index
    %84 = vector.load %arg17[%c0_56, %c0_57, %c0_58] : memref<1x1x32xf32, #tpu.memory_space<vmem>>, vector<1x1x32xf32>
    %85 = vector.shape_cast %84 : vector<1x1x32xf32> to vector<1x32xf32>
    %c0_59 = arith.constant 0 : index
    %c0_60 = arith.constant 0 : index
    %c0_61 = arith.constant 0 : index
    %86 = vector.load %arg18[%c0_59, %c0_60, %c0_61] : memref<1x1x32xf32, #tpu.memory_space<vmem>>, vector<1x1x32xf32>
    %87 = vector.shape_cast %86 : vector<1x1x32xf32> to vector<1x32xf32>
    %cst_62 = arith.constant dense<0.000000e+00> : vector<16xf32>
    %88 = vector.multi_reduction <add>, %83, %cst_62 [1] : vector<16x32xf32> to vector<16xf32>
    %89 = vector.shape_cast %88 : vector<16xf32> to vector<16x1xf32>
    %cst_63 = arith.constant 3.200000e+01 : f32
    %90 = vector.broadcast %cst_63 : f32 to vector<16x1xf32>
    %91 = arith.divf %89, %90 : vector<16x1xf32>
    %92 = vector.broadcast %91 : vector<16x1xf32> to vector<16x32xf32>
    %93 = arith.subf %83, %92 : vector<16x32xf32>
    %94 = arith.mulf %93, %93 : vector<16x32xf32>
    %cst_64 = arith.constant dense<0.000000e+00> : vector<16xf32>
    %95 = vector.multi_reduction <add>, %94, %cst_64 [1] : vector<16x32xf32> to vector<16xf32>
    %96 = vector.shape_cast %95 : vector<16xf32> to vector<16x1xf32>
    %cst_65 = arith.constant 3.200000e+01 : f32
    %97 = vector.broadcast %cst_65 : f32 to vector<16x1xf32>
    %98 = arith.divf %96, %97 : vector<16x1xf32>
    %99 = vector.broadcast %91 : vector<16x1xf32> to vector<16x32xf32>
    %100 = arith.subf %83, %99 : vector<16x32xf32>
    %cst_66 = arith.constant 9.99999997E-7 : f32
    %101 = vector.broadcast %cst_66 : f32 to vector<16x1xf32>
    %102 = arith.addf %98, %101 : vector<16x1xf32>
    %103 = math.rsqrt %102 : vector<16x1xf32>
    %104 = vector.broadcast %103 : vector<16x1xf32> to vector<16x32xf32>
    %105 = arith.mulf %100, %104 : vector<16x32xf32>
    %106 = vector.broadcast %85 : vector<1x32xf32> to vector<16x32xf32>
    %107 = arith.mulf %105, %106 : vector<16x32xf32>
    %108 = vector.broadcast %87 : vector<1x32xf32> to vector<16x32xf32>
    %109 = arith.addf %107, %108 : vector<16x32xf32>
    %c0_67 = arith.constant 0 : index
    %c0_68 = arith.constant 0 : index
    %110 = vector.load %arg20[%c0_67, %c0_68] : memref<16x32xf32, #tpu.memory_space<vmem>>, vector<16x32xf32>
    tpu.vector_store %arg20[%c0_67, %c0_68], %109 {strides = array<i32>} : memref<16x32xf32, #tpu.memory_space<vmem>>, vector<16x32xf32>,
    %c1_i32 = arith.constant 1 : i32
    %111 = arith.cmpi eq, %arg0, %c1_i32 : i32
    %112 = arith.extui %111 : i1 to i32
    %c0_i32_69 = arith.constant 0 : i32
    %113 = arith.cmpi ne, %112, %c0_i32_69 : i32
    scf.if %113 {
      %c0_70 = arith.constant 0 : index
      %c0_71 = arith.constant 0 : index
      %114 = vector.load %arg19[%c0_70, %c0_71] : memref<16x32xf32, #tpu.memory_space<vmem>>, vector<16x32xf32>
      tpu.vector_store %arg19[%c0_70, %c0_71], %109 {strides = array<i32>} : memref<16x32xf32, #tpu.memory_space<vmem>>, vector<16x32xf32>,
    } else {
    }
    return
  }
  func.func @transform_0(%arg0: i32) -> (i32, i32) {
    %c0_i32 = arith.constant 0 : i32
    %c0_i32_0 = arith.constant 0 : i32
    %c0_i32_1 = arith.constant 0 : i32
    return %c0_i32, %c0_i32_0 : i32, i32
  }
  func.func @transform_1(%arg0: i32) -> (i32, i32) {
    %c0_i32 = arith.constant 0 : i32
    %c0_i32_0 = arith.constant 0 : i32
    %c0_i32_1 = arith.constant 0 : i32
    return %c0_i32, %c0_i32_0 : i32, i32
  }
  func.func @transform_2(%arg0: i32) -> (i32, i32) {
    %c0_i32 = arith.constant 0 : i32
    %c0_i32_0 = arith.constant 0 : i32
    %c0_i32_1 = arith.constant 0 : i32
    return %c0_i32, %c0_i32_0 : i32, i32
  }
  func.func @transform_3(%arg0: i32) -> (i32, i32) {
    %c0_i32 = arith.constant 0 : i32
    %c0_i32_0 = arith.constant 0 : i32
    %c0_i32_1 = arith.constant 0 : i32
    return %c0_i32, %c0_i32_0 : i32, i32
  }
  func.func @transform_4(%arg0: i32) -> (i32, i32) {
    %c0_i32 = arith.constant 0 : i32
    %c0_i32_0 = arith.constant 0 : i32
    %c0_i32_1 = arith.constant 0 : i32
    return %c0_i32, %c0_i32_0 : i32, i32
  }
  func.func @transform_5(%arg0: i32) -> (i32, i32) {
    %c0_i32 = arith.constant 0 : i32
    %c0_i32_0 = arith.constant 0 : i32
    %c0_i32_1 = arith.constant 0 : i32
    return %c0_i32, %c0_i32_0 : i32, i32
  }
  func.func @transform_6(%arg0: i32) -> (i32, i32, i32, i32) {
    %c0_i32 = arith.constant 0 : i32
    %c0_i32_0 = arith.constant 0 : i32
    %c0_i32_1 = arith.constant 0 : i32
    %c0_i32_2 = arith.constant 0 : i32
    return %arg0, %c0_i32, %c0_i32_0, %c0_i32_1 : i32, i32, i32, i32
  }
  func.func @transform_7(%arg0: i32) -> (i32, i32, i32, i32) {
    %c0_i32 = arith.constant 0 : i32
    %c0_i32_0 = arith.constant 0 : i32
    %c0_i32_1 = arith.constant 0 : i32
    %c0_i32_2 = arith.constant 0 : i32
    return %arg0, %c0_i32, %c0_i32_0, %c0_i32_1 : i32, i32, i32, i32
  }
  func.func @transform_8(%arg0: i32) -> (i32, i32, i32, i32) {
    %c0_i32 = arith.constant 0 : i32
    %c0_i32_0 = arith.constant 0 : i32
    %c0_i32_1 = arith.constant 0 : i32
    %c0_i32_2 = arith.constant 0 : i32
    return %arg0, %c0_i32, %c0_i32_0, %c0_i32_1 : i32, i32, i32, i32
  }
  func.func @transform_9(%arg0: i32) -> (i32, i32, i32, i32) {
    %c0_i32 = arith.constant 0 : i32
    %c0_i32_0 = arith.constant 0 : i32
    %c0_i32_1 = arith.constant 0 : i32
    %c0_i32_2 = arith.constant 0 : i32
    return %arg0, %c0_i32, %c0_i32_0, %c0_i32_1 : i32, i32, i32, i32
  }
  func.func @transform_10(%arg0: i32) -> (i32, i32, i32) {
    %c0_i32 = arith.constant 0 : i32
    %c0_i32_0 = arith.constant 0 : i32
    %c0_i32_1 = arith.constant 0 : i32
    return %arg0, %c0_i32, %c0_i32_0 : i32, i32, i32
  }
  func.func @transform_11(%arg0: i32) -> (i32, i32, i32) {
    %c0_i32 = arith.constant 0 : i32
    %c0_i32_0 = arith.constant 0 : i32
    %c0_i32_1 = arith.constant 0 : i32
    return %arg0, %c0_i32, %c0_i32_0 : i32, i32, i32
  }
  func.func @transform_12(%arg0: i32) -> (i32, i32, i32) {
    %c0_i32 = arith.constant 0 : i32
    %c0_i32_0 = arith.constant 0 : i32
    %c0_i32_1 = arith.constant 0 : i32
    return %arg0, %c0_i32, %c0_i32_0 : i32, i32, i32
  }
  func.func @transform_13(%arg0: i32) -> (i32, i32, i32) {
    %c0_i32 = arith.constant 0 : i32
    %c0_i32_0 = arith.constant 0 : i32
    %c0_i32_1 = arith.constant 0 : i32
    return %arg0, %c0_i32, %c0_i32_0 : i32, i32, i32
  }
  func.func @transform_14(%arg0: i32) -> (i32, i32, i32) {
    %c0_i32 = arith.constant 0 : i32
    %c0_i32_0 = arith.constant 0 : i32
    %c0_i32_1 = arith.constant 0 : i32
    return %arg0, %c0_i32, %c0_i32_0 : i32, i32, i32
  }
  func.func @transform_15(%arg0: i32) -> (i32, i32, i32) {
    %c0_i32 = arith.constant 0 : i32
    %c0_i32_0 = arith.constant 0 : i32
    %c0_i32_1 = arith.constant 0 : i32
    return %arg0, %c0_i32, %c0_i32_0 : i32, i32, i32
  }
  func.func @transform_16(%arg0: i32) -> (i32, i32, i32) {
    %c0_i32 = arith.constant 0 : i32
    %c0_i32_0 = arith.constant 0 : i32
    %c0_i32_1 = arith.constant 0 : i32
    return %arg0, %c0_i32, %c0_i32_0 : i32, i32, i32
  }
  func.func @transform_17(%arg0: i32) -> (i32, i32, i32) {
    %c0_i32 = arith.constant 0 : i32
    %c0_i32_0 = arith.constant 0 : i32
    %c0_i32_1 = arith.constant 0 : i32
    return %arg0, %c0_i32, %c0_i32_0 : i32, i32, i32
  }
  func.func @transform_18(%arg0: i32) -> (i32, i32) {
    %c0_i32 = arith.constant 0 : i32
    %c0_i32_0 = arith.constant 0 : i32
    %c0_i32_1 = arith.constant 0 : i32
    return %c0_i32, %c0_i32_0 : i32, i32
  }
}

</mosaic_0001>

<bundles_post_ra>
// kernel: tpu_custom_call.1
= control target key start
LH: loop header
LB: loop body
LE: loop exit
PB: predicated region body
PF: predicated region fallthrough
CT: control target
= control target key end

     0   :  { %s4543_s0 = inlined_call_operand.<no memory space> [shape: f32[1,1], index: 0, kind: input, shape index: {}]   ;;  %s4544_s1 = inlined_call_operand.vmem [shape: f32[16,32], index: 1, kind: input, shape index: {}]   ;;  %s4545_s2 = inlined_call_operand.vmem [shape: f32[16,32], index: 2, kind: input, shape index: {}]   ;;  %s4546_s3 = inlined_call_operand.vmem [shape: f32[1,32], index: 3, kind: input, shape index: {}]   ;;  %s4547_s4 = inlined_call_operand.vmem [shape: f32[1,32], index: 4, kind: input, shape index: {}]   ;;  %s4548_s5 = inlined_call_operand.vmem [shape: f32[16,16], index: 5, kind: input, shape index: {}]   ;;  %s4549_s6 = inlined_call_operand.vmem [shape: f32[2,4,32,8], index: 6, kind: input, shape index: {}]   ;;  %s4550_s7 = inlined_call_operand.vmem [shape: f32[2,4,32,8], index: 7, kind: input, shape index: {}]   ;;  %s4551_s8 = inlined_call_operand.vmem [shape: f32[2,4,32,8], index: 8, kind: input, shape index: {}]   ;;  %s4552_s9 = inlined_call_operand.vmem [shape: f32[2,4,8,32], index: 9, kind: input, shape index: {}]   ;;  %s4553_s10 = inlined_call_operand.vmem [shape: f32[2,1,32], index: 10, kind: input, shape index: {}]   ;;  %s4554_s11 = inlined_call_operand.vmem [shape: f32[2,1,32], index: 11, kind: input, shape index: {}]   ;;  %s4555_s12 = inlined_call_operand.vmem [shape: f32[2,32,64], index: 12, kind: input, shape index: {}]   ;;  %s4556_s13 = inlined_call_operand.vmem [shape: f32[2,1,64], index: 13, kind: input, shape index: {}]   ;;  %s4557_s14 = inlined_call_operand.vmem [shape: f32[2,64,32], index: 14, kind: input, shape index: {}]   ;;  %s4558_s15 = inlined_call_operand.vmem [shape: f32[2,1,32], index: 15, kind: input, shape index: {}]   ;;  %s4559_s16 = inlined_call_operand.vmem [shape: f32[2,1,32], index: 16, kind: input, shape index: {}]   ;;  %s4560_s17 = inlined_call_operand.vmem [shape: f32[2,1,32], index: 17, kind: input, shape index: {}]   ;;  %s4561_s18 = inlined_call_operand.hbm [shape: f32[16,32], index: 18, kind: output, shape index: {}]  }
   0x1   :  { %4568 = sst [smem:[#allocation9_spill]] %s4543_s0 }
   0x2   :  { %4569 = sst [smem:[#allocation10_spill]] %s4544_s1  ;;  %s4578_s29 = sld [smem:[#allocation9_spill]] }
   0x3   :  { %4570 = sst [smem:[#allocation11_spill]] %s4545_s2 }
   0x4   :  { %4571 = sst [smem:[#allocation12_spill]] %s4547_s4 }
   0x5   :  { %4572 = sst [smem:[#allocation13_spill]] %s4548_s5 }
   0x6   :  { %4573 = sst [smem:[#allocation14_spill]] %s4549_s6 }
   0x7   :  { %4574 = sst [smem:[#allocation15_spill]] %s4550_s7 }
   0x8   :  { %4575 = sst [smem:[#allocation16_spill]] %s4551_s8  ;;  %v23_v0 = vstv %s4578_s29 }
   0x9   :  { %4576 = sst [smem:[#allocation17_spill]] %s4552_s9  ;;  %24 = vst [vmem:[#allocation3] sm:$0x1] %v23_v0 }
   0xa   :  { %4577 = sst [smem:[#allocation18_spill]] %s4561_s18 }
   0xb   :  { %25 = vsyncpa [#allocation5], 0  ;;  %s4174_s30 = smov 0  }
   0xc LB: > { %4579 = sst [smem:[#allocation7_spill]] %s4070_s30  ;;  %s4180_s0 = sadd.s32 4294967295, %s4070_s30   ;;  %s4070_s30 = sphi %s4174_s30, %s31_s30  }
   0xd   : > { %p3345_p0 = scmp.ge.s32.totalorder %s4070_s30, 1  ;;  %p608_p1 = scmp.lt.s32.totalorder %s4070_s30, 3 }
   0xf   : > { %p609_p2 = pnand %p3345_p0, %p608_p1 }
  0x11   : > { %612 = sbr.rel (%p609_p2) target bundleno = 2692 (0xa84), region = 92 }
  0x18   : > { %p700_p3 = scmp.lt.s32.totalorder %s4180_s0, 1  ;;  %s4580_s6 = sld [smem:[#allocation14_spill]] }
  0x19   : > { %s4581_s7 = sld [smem:[#allocation15_spill]]  ;;  %s4583_s8 = sld [smem:[#allocation16_spill]] }
  0x1a   : > { %s4186_s19 = scalar_select %p700_p3, %s4180_s0, 1 }
  0x1b   : > { %s4584_s9 = sld [smem:[#allocation17_spill]]  ;;  %p3358_p4 = scmp.ne.s32.totalorder %s4180_s0, 0 }
  0x1c   : > { %s3433_s1 = sshll.u32 %s4186_s19, 7  ;;  %s3436_s20 = sshll.u32 %s4186_s19, 5  ;;  %vm760_vm0 = vcmask (!%p3358_p4), 261120   ;;  %v3359_v26 = vld [vmem:[%s4546_s3] ss:$0 sm:$0xff] (!%p3358_p4) }
  0x1d   : > { %s733_s27 = scalar_lea.vmem %s4556_s13, %s4186_s19  ;;  %s3438_s30 = sshll.u32 %s4186_s19, 6 }
  0x1e   : > { %s4193_s2 = scalar_lea.vmem %s4580_s6, %s3433_s1  ;;  %s4235_s21 = scalar_lea.vmem %s4557_s14, %s3438_s30 }
  0x1f   : > { %s4198_s25 = scalar_lea.vmem %s4581_s7, %s3433_s1  ;;  %s4203_s28 = scalar_lea.vmem %s4583_s8, %s3433_s1 }
  0x20   : > { %4582 = sst [smem:[#allocation8_spill]] %s4198_s25  ;;  %s4221_s25 = scalar_lea.vmem %s4555_s12, %s3436_s20 }
  0x21   : > { %s4208_s18 = scalar_lea.vmem %s4584_s9, %s3436_s20  ;;  %s744_s7 = scalar_lea.vmem %s4559_s16, %s4186_s19 }
  0x22   : > { %s747_s23 = scalar_lea.vmem %s4560_s17, %s4186_s19  ;;  %751 = sbr.rel (%p3358_p4) target bundleno = 363 (0x16b), region = 96 }
  0x23   : > { %s4585_s8 = sld [smem:[#allocation10_spill]] (!%p3358_p4)  ;;  %s4586_s4 = sld [smem:[#allocation11_spill]] (!%p3358_p4) }
  0x24   : > { %s4587_s26 = sld [smem:[#allocation12_spill]] (!%p3358_p4) }
  0x29   : > { %v752_v1 = vld [vmem:[%s4585_s8] sm:$0xff]  ;;  %v753_v3 = vld [vmem:[%s4585_s8 + $0x8] sm:$0xff] }
  0x2a   : > { %v754_v2 = vld [vmem:[%s4586_s4] sm:$0xff]  ;;  %v755_v5 = vld [vmem:[%s4586_s4 + $0x8] sm:$0xff] }
  0x2b   : > { %v756_v4 = vadd.f32 %v754_v2, %v752_v1  ;;  %v757_v6 = vadd.f32 %v755_v5, %v753_v3  ;;  %v3360_v28 = vld [vmem:[%s4587_s26] ss:$0 sm:$0xff] }
  0x2d   : > { %v761_v7 = vsel %vm760_vm0, %v756_v4, 0.0  ;;  %v764_v8 = vsel %vm760_vm0, %v757_v6, 0.0 }
  0x2e   : > { %762 = vadd.xlane.f32.xlu0 %v761_v7 }
  0x32   : > { %765 = vadd.xlane.f32.xlu0 %v764_v8 }
  0xbb   : > { %v763_v9 = vpop.xlane.xlu0 %762 }
  0xbc   : > { %v768_v10 = vmul.f32 0.03125, %v763_v9 }
  0xbe   : > { %v770_v11 = vsub.f32 %v756_v4, %v768_v10 }
  0xbf   : > { %v766_v12 = vpop.xlane.xlu0 %765 }
  0xc0   : > { %v769_v13 = vmul.f32 0.03125, %v766_v12  ;;  %v772_v14 = vmul.f32 %v770_v11, %v770_v11 }
  0xc2   : > { %v771_v15 = vsub.f32 %v757_v6, %v769_v13  ;;  %v774_v16 = vsel %vm760_vm0, %v772_v14, 0.0 }
  0xc3   : > { %775 = vadd.xlane.f32.xlu1 %v774_v16 }
  0xc4   : > { %v773_v17 = vmul.f32 %v771_v15, %v771_v15 }
  0xc6   : > { %v777_v18 = vsel %vm760_vm0, %v773_v17, 0.0 }
  0xc7   : > { %778 = vadd.xlane.f32.xlu1 %v777_v18 }
 0x150   : > { %v776_v19 = vpop.xlane.xlu1 %775 }
 0x151   : > { %v780_v20 = vmul.f32 0.03125, %v776_v19 }
 0x153   : > { %v782_v21 = vadd.f32 1e-06, %v780_v20 }
 0x154   : > { %v779_v22 = vpop.xlane.xlu1 %778 }
 0x155   : > { %3987 = vrsqrt.f32 %v782_v21  ;;  %v781_v23 = vmul.f32 0.03125, %v779_v22 }
 0x157   : > { %v783_v24 = vadd.f32 1e-06, %v781_v23 }
 0x159   : > { %3989 = vrsqrt.f32 %v783_v24 }
 0x15f   : > { %v3988_v25 = vpop.eup %3987 }
 0x160   : > { %v786_v27 = vmul.f32 %v3988_v25, %v770_v11 }
 0x162   : > { %v794_v29 = vmul.f32 %v3359_v26, %v786_v27 }
 0x163   : > { %v3990_v30 = vpop.eup %3989 }
 0x164   : > { %v802_v31 = vadd.f32 %v3360_v28, %v794_v29  ;;  %v787_v32 = vmul.f32 %v3990_v30, %v771_v15 }
 0x166   : > { %804 = vst.msk [vmem:[#allocation2] sm:$0xff] %vm760_vm0, %v802_v31  ;;  %v795_v33 = vmul.f32 %v3359_v26, %v787_v32 }
 0x168   : > { %v803_v34 = vadd.f32 %v3360_v28, %v795_v33 }
 0x16a   : > { %805 = vst.msk [vmem:[#allocation2 + $0x8] sm:$0xff] %vm760_vm0, %v803_v34 }
 0x16b PF: > { %v808_v35 = vld [vmem:[%s4193_s2] sm:$0xff]  ;;  %v809_v36 = vld [vmem:[%s4193_s2 + $0x8] sm:$0xff]  ;;  %vm860_vm1 = vcmask 261120   ;;  %v810_v40 = vld [vmem:[%s4193_s2 + $0x10] sm:$0xff]  ;;  %v4072_v42 = vmov 0   ;;  %s4588_s29 = sld [smem:[#allocation8_spill]]  ;;  %s4593_s9 = scalar_lea.vmem %s4553_s10, %s4186_s19 }
 0x16c   : > { %v812_v37 = vld [vmem:[%s4193_s2 + $0x20] sm:$0xff]  ;;  %v3809_v38 = vpack.c.bf16 %v809_v36, %v808_v35  ;;  %v813_v39 = vld [vmem:[%s4193_s2 + $0x28] sm:$0xff]  ;;  %v811_v41 = vld [vmem:[%s4193_s2 + $0x18] sm:$0xff]  ;;  %3991 = vset.pattern.permute.xlu0 %v4072_v42  ;;  %vm1788_vm2 = vcmask 64512   ;;  %s4591_s30 = sld [smem:[#allocation13_spill]]  ;;  %vm2137_vm4 = vcmask 130048   ;;  %s4594_s1 = scalar_lea.vmem %s4554_s11, %s4186_s19 }
 0x16d   : > { %v3817_v43 = vpack.c.bf16 %v813_v39, %v812_v37  ;;  %v3813_v44 = vpack.c.bf16 %v811_v41, %v810_v40  ;;  %v814_v45 = vld [vmem:[%s4193_s2 + $0x30] sm:$0xff]  ;;  %v815_v46 = vld [vmem:[%s4193_s2 + $0x38] sm:$0xff]  ;;  %v4278_v47 = vld [vmem:[#allocation2] sm:$0xff]  ;;  %vm3044_vm5 = vcmask 523264   ;;  %p3428_p5 = scmp.ne.s32.totalorder %s4180_s0, 1 }
 0x16e   : > { %3810 = vmatprep.subr.bf16.mxu0 %v3809_v38  ;;  %v3821_v48 = vpack.c.bf16 %v815_v46, %v814_v45  ;;  %3579 = vmatprep.mubr.msk.f32.mxu0 %vm860_vm1, %v4278_v47  ;;  %v816_v49 = vld [vmem:[%s4193_s2 + $0x40] sm:$0xff]  ;;  %v817_v50 = vld [vmem:[%s4193_s2 + $0x48] sm:$0xff]  ;;  %v818_v55 = vld [vmem:[%s4193_s2 + $0x50] sm:$0xff] }
 0x16f   : > { %3818 = vmatprep.subr.bf16.mxu1 %v3817_v43  ;;  %3812 = vmatpush3.bf16.msra.mxu0 %v3809_v38  ;;  %v820_v51 = vld [vmem:[%s4193_s2 + $0x60] sm:$0xff]  ;;  %v821_v52 = vld [vmem:[%s4193_s2 + $0x68] sm:$0xff]  ;;  %v3825_v53 = vpack.c.bf16 %v817_v50, %v816_v49  ;;  %v819_v56 = vld [vmem:[%s4193_s2 + $0x58] sm:$0xff] }
 0x170   : > { %3820 = vmatpush3.bf16.msra.mxu1 %v3817_v43  ;;  %3814 = vmatprep.subr.bf16.mxu0 %v3813_v44  ;;  %v3833_v54 = vpack.c.bf16 %v821_v52, %v820_v51  ;;  %v822_v57 = vld [vmem:[%s4193_s2 + $0x70] sm:$0xff]  ;;  %v823_v58 = vld [vmem:[%s4193_s2 + $0x78] sm:$0xff]  ;;  %v3829_v60 = vpack.c.bf16 %v819_v56, %v818_v55  ;;  %v840_v23 = vld [vmem:[%s4203_s28] sm:$0xff] }
 0x171   : > { %3822 = vmatprep.subr.bf16.mxu1 %v3821_v48  ;;  %3590 = vmatprep.mubr.msk.f32.mxu1 %vm860_vm1, %v4278_v47  ;;  %v4292_v59 = vld [vmem:[#allocation2 + $0x8] sm:$0xff]  ;;  %v3837_v61 = vpack.c.bf16 %v823_v58, %v822_v57  ;;  %v824_v62 = vld [vmem:[%s4588_s29] sm:$0xff]  ;;  %v3385_v2 = vld [vmem:[#allocation3] ss:$0 sm:$0xff] }
 0x172   : > { %v825_v63 = vld [vmem:[%s4588_s29 + $0x8] sm:$0xff]  ;;  %v828_v0 = vld [vmem:[%s4588_s29 + $0x20] sm:$0xff]  ;;  %v826_v5 = vld [vmem:[%s4588_s29 + $0x10] sm:$0xff]  ;;  %1774 = vperm.xlu0 %3991, %v3385_v2   ;;  %s4592_s5 = smov %s4591_s30 }
 0x173   : > { %3816 = vmatpush3.bf16.msra.mxu0 %v3813_v44  ;;  %v829_v1 = vld [vmem:[%s4588_s29 + $0x28] sm:$0xff]  ;;  %v3841_v3 = vpack.c.bf16 %v825_v63, %v824_v62  ;;  %v827_v6 = vld [vmem:[%s4588_s29 + $0x18] sm:$0xff]  ;;  %v830_v7 = vld [vmem:[%s4588_s29 + $0x30] sm:$0xff] }
 0x174   : > { %3824 = vmatpush3.bf16.msra.mxu1 %v3821_v48  ;;  %3826 = vmatprep.subr.bf16.mxu0 %v3825_v53  ;;  %v3849_v4 = vpack.c.bf16 %v829_v1, %v828_v0  ;;  %v831_v8 = vld [vmem:[%s4588_s29 + $0x38] sm:$0xff]  ;;  %v3845_v9 = vpack.c.bf16 %v827_v6, %v826_v5  ;;  %v832_v11 = vld [vmem:[%s4588_s29 + $0x40] sm:$0xff]  ;;  %v833_v12 = vld [vmem:[%s4588_s29 + $0x48] sm:$0xff] }
 0x175   : > { %3834 = vmatprep.subr.bf16.mxu1 %v3833_v54  ;;  %v3853_v10 = vpack.c.bf16 %v831_v8, %v830_v7  ;;  %v836_v13 = vld [vmem:[%s4588_s29 + $0x60] sm:$0xff]  ;;  %v837_v14 = vld [vmem:[%s4588_s29 + $0x68] sm:$0xff]  ;;  %v3857_v15 = vpack.c.bf16 %v833_v12, %v832_v11  ;;  %v834_v17 = vld [vmem:[%s4588_s29 + $0x50] sm:$0xff] }
 0x176   : > { %3580 = vmatmul.mubr.msk.f32.vlgmr.msra.gmra.mrb[0].mxu0 %vm860_vm1, %v4292_v59  ;;  %v3865_v16 = vpack.c.bf16 %v837_v14, %v836_v13  ;;  %v835_v18 = vld [vmem:[%s4588_s29 + $0x58] sm:$0xff]  ;;  %v838_v19 = vld [vmem:[%s4588_s29 + $0x70] sm:$0xff]  ;;  %v841_v24 = vld [vmem:[%s4203_s28 + $0x8] sm:$0xff] }
 0x177   : > { %3591 = vmatmul.mubr.msk.f32.vlgmr.msra.gmra.mrb[0].mxu1 %vm860_vm1, %v4292_v59  ;;  %3828 = vmatpush3.bf16.msra.mxu0 %v3825_v53  ;;  %v839_v20 = vld [vmem:[%s4588_s29 + $0x78] sm:$0xff]  ;;  %v3861_v21 = vpack.c.bf16 %v835_v18, %v834_v17  ;;  %v844_v25 = vld [vmem:[%s4203_s28 + $0x20] sm:$0xff]  ;;  %v845_v26 = vld [vmem:[%s4203_s28 + $0x28] sm:$0xff]  ;;  %v3873_v27 = vpack.c.bf16 %v841_v24, %v840_v23 }
 0x178   : > { %3836 = vmatpush3.bf16.msra.mxu1 %v3833_v54  ;;  %3830 = vmatprep.subr.bf16.mxu0 %v3829_v60  ;;  %v3869_v22 = vpack.c.bf16 %v839_v20, %v838_v19  ;;  %v842_v28 = vld [vmem:[%s4203_s28 + $0x10] sm:$0xff]  ;;  %v843_v29 = vld [vmem:[%s4203_s28 + $0x18] sm:$0xff]  ;;  %v3881_v30 = vpack.c.bf16 %v845_v26, %v844_v25  ;;  %v848_v35 = vld [vmem:[%s4203_s28 + $0x40] sm:$0xff] }
 0x179   : > { %3838 = vmatprep.subr.bf16.mxu1 %v3837_v61  ;;  %3601 = vmatprep.mubr.msk.f32.mxu0 %vm860_vm1, %v4278_v47  ;;  %v846_v31 = vld [vmem:[%s4203_s28 + $0x30] sm:$0xff]  ;;  %v847_v32 = vld [vmem:[%s4203_s28 + $0x38] sm:$0xff]  ;;  %v3877_v33 = vpack.c.bf16 %v843_v29, %v842_v28  ;;  %v849_v36 = vld [vmem:[%s4203_s28 + $0x48] sm:$0xff] }
 0x17a   : > { %3612 = vmatprep.mubr.msk.f32.mxu1 %vm860_vm1, %v4278_v47  ;;  %v3885_v34 = vpack.c.bf16 %v847_v32, %v846_v31  ;;  %v852_v37 = vld [vmem:[%s4203_s28 + $0x60] sm:$0xff]  ;;  %v853_v38 = vld [vmem:[%s4203_s28 + $0x68] sm:$0xff]  ;;  %v3889_v39 = vpack.c.bf16 %v849_v36, %v848_v35  ;;  %v850_v40 = vld [vmem:[%s4203_s28 + $0x50] sm:$0xff] }
 0x17b   : > { %3832 = vmatpush3.bf16.msra.mxu0 %v3829_v60  ;;  %v851_v41 = vld [vmem:[%s4203_s28 + $0x58] sm:$0xff]  ;;  %v3897_v42 = vpack.c.bf16 %v853_v38, %v852_v37  ;;  %v854_v44 = vld [vmem:[%s4203_s28 + $0x70] sm:$0xff]  ;;  %vm4374_vm3 = vmpackc.low %vm1788_vm2, %vm1788_vm2 }
 0x17c   : > { %3840 = vmatpush3.bf16.msra.mxu1 %v3837_v61  ;;  %3842 = vmatprep.subr.bf16.mxu0 %v3841_v3  ;;  %v3893_v43 = vpack.c.bf16 %v851_v41, %v850_v40  ;;  %v855_v45 = vld [vmem:[%s4203_s28 + $0x78] sm:$0xff]  ;;  %v1787_v28 = vld [vmem:[%s4591_s30 + $0x8] sm:$0xff]  ;;  %v1786_v29 = vld [vmem:[%s4592_s5] sm:$0xff] }
 0x17d   : > { %3850 = vmatprep.subr.bf16.mxu1 %v3849_v4  ;;  %v3901_v46 = vpack.c.bf16 %v855_v45, %v854_v44 }
 0x17e   : > { %3602 = vmatmul.mubr.msk.f32.vlgmr.msra.gmra.mrb[2].mxu0 %vm860_vm1, %v4292_v59 }
 0x17f   : > { %3613 = vmatmul.mubr.msk.f32.vlgmr.msra.gmra.mrb[2].mxu1 %vm860_vm1, %v4292_v59  ;;  %3844 = vmatpush3.bf16.msra.mxu0 %v3841_v3 }
 0x180   : > { %3852 = vmatpush3.bf16.msra.mxu1 %v3849_v4  ;;  %3846 = vmatprep.subr.bf16.mxu0 %v3845_v9 }
 0x181   : > { %3854 = vmatprep.subr.bf16.mxu1 %v3853_v10  ;;  %3623 = vmatprep.mubr.msk.f32.mxu0 %vm860_vm1, %v4278_v47 }
 0x182   : > { %3634 = vmatprep.mubr.msk.f32.mxu1 %vm860_vm1, %v4278_v47 }
 0x183   : > { %3848 = vmatpush3.bf16.msra.mxu0 %v3845_v9 }
 0x184   : > { %3856 = vmatpush3.bf16.msra.mxu1 %v3853_v10  ;;  %3858 = vmatprep.subr.bf16.mxu0 %v3857_v15 }
 0x185   : > { %3866 = vmatprep.subr.bf16.mxu1 %v3865_v16 }
 0x186   : > { %3624 = vmatmul.mubr.msk.f32.vlgmr.msra.gmra.mrb[4].mxu0 %vm860_vm1, %v4292_v59 }
 0x187   : > { %3635 = vmatmul.mubr.msk.f32.vlgmr.msra.gmra.mrb[4].mxu1 %vm860_vm1, %v4292_v59  ;;  %3860 = vmatpush3.bf16.msra.mxu0 %v3857_v15 }
 0x188   : > { %3868 = vmatpush3.bf16.msra.mxu1 %v3865_v16  ;;  %3862 = vmatprep.subr.bf16.mxu0 %v3861_v21 }
 0x189   : > { %3870 = vmatprep.subr.bf16.mxu1 %v3869_v22  ;;  %3645 = vmatprep.mubr.msk.f32.mxu0 %vm860_vm1, %v4278_v47 }
 0x18a   : > { %3656 = vmatprep.mubr.msk.f32.mxu1 %vm860_vm1, %v4278_v47 }
 0x18b   : > { %3864 = vmatpush3.bf16.msra.mxu0 %v3861_v21 }
 0x18c   : > { %3872 = vmatpush3.bf16.msra.mxu1 %v3869_v22  ;;  %3874 = vmatprep.subr.bf16.mxu0 %v3873_v27 }
 0x18d   : > { %3882 = vmatprep.subr.bf16.mxu1 %v3881_v30 }
 0x18e   : > { %3646 = vmatmul.mubr.msk.f32.vlgmr.msra.gmra.mrb[6].mxu0 %vm860_vm1, %v4292_v59 }
 0x18f   : > { %3657 = vmatmul.mubr.msk.f32.vlgmr.msra.gmra.mrb[6].mxu1 %vm860_vm1, %v4292_v59  ;;  %3876 = vmatpush3.bf16.msra.mxu0 %v3873_v27 }
 0x190   : > { %3878 = vmatprep.subr.bf16.mxu0 %v3877_v33  ;;  %3884 = vmatpush3.bf16.msra.mxu1 %v3881_v30 }
 0x191   : > { %3667 = vmatprep.mubr.msk.f32.mxu0 %vm860_vm1, %v4278_v47  ;;  %3886 = vmatprep.subr.bf16.mxu1 %v3885_v34 }
 0x192   : > { %3678 = vmatprep.mubr.msk.f32.mxu1 %vm860_vm1, %v4278_v47 }
 0x193   : > { %3880 = vmatpush3.bf16.msra.mxu0 %v3877_v33 }
 0x194   : > { %3890 = vmatprep.subr.bf16.mxu0 %v3889_v39  ;;  %3888 = vmatpush3.bf16.msra.mxu1 %v3885_v34 }
 0x195   : > { %3898 = vmatprep.subr.bf16.mxu1 %v3897_v42 }
 0x196   : > { %3668 = vmatmul.mubr.msk.f32.vlgmr.msra.gmra.mrb[8].mxu0 %vm860_vm1, %v4292_v59 }
 0x197   : > { %3892 = vmatpush3.bf16.msra.mxu0 %v3889_v39  ;;  %3679 = vmatmul.mubr.msk.f32.vlgmr.msra.gmra.mrb[8].mxu1 %vm860_vm1, %v4292_v59 }
 0x198   : > { %3894 = vmatprep.subr.bf16.mxu0 %v3893_v43  ;;  %3900 = vmatpush3.bf16.msra.mxu1 %v3897_v42 }
 0x199   : > { %3689 = vmatprep.mubr.msk.f32.mxu0 %vm860_vm1, %v4278_v47  ;;  %3700 = vmatprep.mubr.msk.f32.mxu1 %vm860_vm1, %v4278_v47 }
 0x19a   : > { %3902 = vmatprep.subr.bf16.mxu1 %v3901_v46 }
 0x19b   : > { %3896 = vmatpush3.bf16.msra.mxu0 %v3893_v43 }
 0x19c   : > { %3904 = vmatpush3.bf16.msra.mxu1 %v3901_v46 }
 0x19e   : > { %3690 = vmatmul.mubr.msk.f32.vlgmr.msra.gmra.mrb[10].mxu0 %vm860_vm1, %v4292_v59 }
 0x19f   : > { %3701 = vmatmul.mubr.msk.f32.vlgmr.msra.gmra.mrb[10].mxu1 %vm860_vm1, %v4292_v59 }
 0x1f1   : > { %v1775_v48 = vpop.permute.xlu0 %1774 }
 0x1f2   : > { %3992 = vrcp.f32 %v1775_v48 }
 0x1fc   : > { %v3993_v49 = vpop.eup %3992 }
 0x249   : > { %v3581_v50 = vpop.f32.mrb[0].mxu0 }
 0x24a   : > { %v933_v51 = vpop.f32.mrb[1].mxu0  ;;  %v3592_v52 = vpop.f32.mrb[0].mxu1  ;;  %v1779_v7 = vmul.f32 %v3993_v49, %v3581_v50 }
 0x24b   : > { %v1778_v53 = vmul.f32 %v3993_v49, %v933_v51  ;;  %v1008_v54 = vpop.f32.mrb[1].mxu1  ;;  %v1781_v10 = vmul.f32 %v3993_v49, %v3592_v52 }
 0x24c   : > { %v1780_v55 = vmul.f32 %v3993_v49, %v1008_v54 }
 0x24d   : > { %3707 = vmatprep.mubr.msk.f32.mxu0 %vm1788_vm2, %v1778_v53 }
 0x24e   : > { %3714 = vmatprep.mubr.msk.f32.mxu1 %vm1788_vm2, %v1780_v55 }
 0x251   : > { %v3603_v56 = vpop.f32.mrb[2].mxu0 }
 0x252   : > { %v1083_v57 = vpop.f32.mrb[3].mxu0  ;;  %v3614_v58 = vpop.f32.mrb[2].mxu1  ;;  %v1783_v19 = vmul.f32 %v3993_v49, %v3603_v56 }
 0x253   : > { %v1158_v60 = vpop.f32.mrb[3].mxu1  ;;  %v1782_v12 = vmul.f32 %v3993_v49, %v1083_v57  ;;  %v1785_v21 = vmul.f32 %v3993_v49, %v3614_v58 }
 0x254   : > { %v1784_v13 = vmul.f32 %v3993_v49, %v1158_v60 }
 0x259   : > { %v3625_v61 = vpop.f32.mrb[4].mxu0 }
 0x25a   : > { %v3636_v62 = vpop.f32.mrb[4].mxu1  ;;  %v1233_v63 = vpop.f32.mrb[5].mxu0 }
 0x25b   : > { %v3905_v1 = vpack.c.bf16 %v3625_v61, %v1233_v63  ;;  %v1308_v2 = vpop.f32.mrb[5].mxu1 }
 0x25c   : > { %v3911_v3 = vpack.c.bf16 %v3636_v62, %v1308_v2 }
 0x25d   : > { %3907 = vmatprep.subr.msk.bf16.mxu0 %vm4374_vm3, %v3905_v1 }
 0x25e   : > { %3913 = vmatprep.subr.msk.bf16.mxu1 %vm4374_vm3, %v3911_v3  ;;  %3910 = vmatpush3.bf16.xpose.msk.msra.mxu0 %vm4374_vm3, %v3905_v1 }
 0x25f   : > { %3916 = vmatpush3.bf16.xpose.msk.msra.mxu1 %vm4374_vm3, %v3911_v3 }
 0x261   : > { %v3647_v4 = vpop.f32.mrb[6].mxu0 }
 0x262   : > { %v3658_v5 = vpop.f32.mrb[6].mxu1  ;;  %v1383_v6 = vpop.f32.mrb[7].mxu0 }
 0x263   : > { %v3917_v8 = vpack.c.bf16 %v3647_v4, %v1383_v6  ;;  %v1458_v9 = vpop.f32.mrb[7].mxu1 }
 0x264   : > { %v3923_v11 = vpack.c.bf16 %v3658_v5, %v1458_v9 }
 0x265   : > { %3708 = vmatmul.mubr.msk.f32.vlgmr.msra.gmra.mrb[12].mxu0 %vm1788_vm2, %v1779_v7  ;;  %3919 = vmatprep.subr.msk.bf16.mxu0 %vm4374_vm3, %v3917_v8 }
 0x266   : > { %3715 = vmatmul.mubr.msk.f32.vlgmr.msra.gmra.mrb[12].mxu1 %vm1788_vm2, %v1781_v10  ;;  %3925 = vmatprep.subr.msk.bf16.mxu1 %vm4374_vm3, %v3923_v11 }
 0x267   : > { %3922 = vmatpush3.bf16.xpose.msk.msra.mxu0 %vm4374_vm3, %v3917_v8  ;;  %3721 = vmatprep.mubr.msk.f32.mxu0 %vm1788_vm2, %v1782_v12 }
 0x268   : > { %3928 = vmatpush3.bf16.xpose.msk.msra.mxu1 %vm4374_vm3, %v3923_v11  ;;  %3728 = vmatprep.mubr.msk.f32.mxu1 %vm1788_vm2, %v1784_v13 }
 0x269   : > { %v3669_v14 = vpop.f32.mrb[8].mxu0 }
 0x26a   : > { %v1533_v15 = vpop.f32.mrb[9].mxu0  ;;  %v3680_v16 = vpop.f32.mrb[8].mxu1 }
 0x26b   : > { %v3929_v17 = vpack.c.bf16 %v3669_v14, %v1533_v15  ;;  %v1608_v18 = vpop.f32.mrb[9].mxu1 }
 0x26c   : > { %v4398_v20 = vpack.c.bf16 %v3680_v16, %v1608_v18 }
 0x26d   : > { %3930 = vmatprep.subr.bf16.mxu0 %v3929_v17 }
 0x26e   : > { %3722 = vmatmul.mubr.msk.f32.vlgmr.msra.gmra.mrb[14].mxu0 %vm1788_vm2, %v1783_v19 }
 0x26f   : > { %3729 = vmatmul.mubr.msk.f32.vlgmr.msra.gmra.mrb[14].mxu1 %vm1788_vm2, %v1785_v21  ;;  %3932 = vmatpush3.bf16.msra.mxu0 %v3929_v17 }
 0x270   : > { %3934 = vmatprep.subr.bf16.mxu0 %v4398_v20 }
 0x271   : > { %v3691_v22 = vpop.f32.mrb[10].mxu0 }
 0x272   : > { %v1683_v23 = vpop.f32.mrb[11].mxu0  ;;  %v3702_v25 = vpop.f32.mrb[10].mxu1 }
 0x273   : > { %v4403_v24 = vpack.c.bf16 %v3691_v22, %v1683_v23  ;;  %v1758_v26 = vpop.f32.mrb[11].mxu1 }
 0x274   : > { %v3941_v27 = vpack.c.bf16 %v3702_v25, %v1758_v26 }
 0x276   : > { %3942 = vmatprep.subr.bf16.mxu1 %v3941_v27 }
 0x277   : > { %3944 = vmatpush3.bf16.msra.mxu1 %v3941_v27 }
 0x338   : > { %v3709_v30 = vpop.f32.mrb[12].mxu0 }
 0x339   : > { %v1873_v31 = vadd.f32 %v3709_v30, %v1787_v28  ;;  %v3716_v32 = vpop.f32.mrb[12].mxu1  ;;  %v1867_v33 = vpop.f32.mrb[13].mxu0 }
 0x33a   : > { %v1868_v34 = vadd.f32 %v1867_v33, %v1786_v29  ;;  %v1954_v35 = vpop.f32.mrb[13].mxu1  ;;  %v1960_v36 = vadd.f32 %v3716_v32, %v1787_v28 }
 0x33b   : > { %v2141_v37 = vsel %vm2137_vm4, %v1873_v31, -inf  ;;  %v1955_v39 = vadd.f32 %v1954_v35, %v1786_v29 }
 0x33c   : > { %2142 = vmax.xlane.f32.xlu1 %v2141_v37  ;;  %v2138_v38 = vsel %vm2137_vm4, %v1868_v34, -inf  ;;  %v2147_v40 = vsel %vm2137_vm4, %v1960_v36, -inf }
 0x33d   : > { %2139 = vmax.xlane.f32.xlu0 %v2138_v38  ;;  %v2144_v46 = vsel %vm2137_vm4, %v1955_v39, -inf }
 0x340   : > { %2148 = vmax.xlane.f32.xlu1 %v2147_v40 }
 0x341   : > { %v3723_v41 = vpop.f32.mrb[14].mxu0 }
 0x342   : > { %v3730_v42 = vpop.f32.mrb[14].mxu1  ;;  %v2041_v43 = vpop.f32.mrb[15].mxu0  ;;  %v2047_v44 = vadd.f32 %v3723_v41, %v1787_v28 }
 0x343   : > { %v2128_v45 = vpop.f32.mrb[15].mxu1  ;;  %v2042_v48 = vadd.f32 %v2041_v43, %v1786_v29  ;;  %v2134_v52 = vadd.f32 %v3730_v42, %v1787_v28 }
 0x344   : > { %2145 = vmax.xlane.f32.xlu1 %v2144_v46  ;;  %v2153_v49 = vsel %vm2137_vm4, %v2047_v44, -inf  ;;  %v2129_v50 = vadd.f32 %v2128_v45, %v1786_v29 }
 0x345   : > { %v2150_v51 = vsel %vm2137_vm4, %v2042_v48, -inf  ;;  %v2159_v54 = vsel %vm2137_vm4, %v2134_v52, -inf }
 0x346   : > { %v2156_v53 = vsel %vm2137_vm4, %v2129_v50, -inf }
 0x348   : > { %2154 = vmax.xlane.f32.xlu1 %v2153_v49 }
 0x34c   : > { %2151 = vmax.xlane.f32.xlu1 %v2150_v51 }
 0x350   : > { %2157 = vmax.xlane.f32.xlu1 %v2156_v53 }
 0x354   : > { %2160 = vmax.xlane.f32.xlu1 %v2159_v54 }
 0x3c9   : > { %v2143_v55 = vpop.xlane.xlu1 %2142 }
 0x3ca   : > { %v2163_v56 = vsub.f32 %v1873_v31, %v2143_v55  ;;  %v2140_v57 = vpop.xlane.xlu0 %2139 }
 0x3cb   : > { %v2162_v58 = vsub.f32 %v1868_v34, %v2140_v57 }
 0x3cc   : > { %v2172_v60 = vmul.f32 1.442695, %v2163_v56 }
 0x3cd   : > { %v2170_v61 = vmul.f32 1.442695, %v2162_v58  ;;  %v2149_v62 = vpop.xlane.xlu1 %2148  ;;  %v857_v58 = vld [vmem:[%s4208_s18 + $0x8] sm:$0xff] }
 0x3ce   : > { %3994 = vpow2.f32 %v2172_v60  ;;  %v2165_v63 = vsub.f32 %v1960_v36, %v2149_v62  ;;  %3764 = vmatprep.subr.mxu1 %v857_v58  ;;  %v858_v60 = vld [vmem:[%s4208_s18 + $0x10] sm:$0xff] }
 0x3cf   : > { %3996 = vpow2.f32 %v2170_v61  ;;  %v859_v61 = vld [vmem:[%s4208_s18 + $0x18] sm:$0xff] }
 0x3d0   : > { %v2176_v0 = vmul.f32 1.442695, %v2165_v63 }
 0x3d1   : > { %v2146_v1 = vpop.xlane.xlu1 %2145 }
 0x3d2   : > { %v2164_v2 = vsub.f32 %v1955_v39, %v2146_v1  ;;  %3998 = vpow2.f32 %v2176_v0 }
 0x3d4   : > { %v2174_v3 = vmul.f32 1.442695, %v2164_v2 }
 0x3d5   : > { %v2155_v4 = vpop.xlane.xlu1 %2154 }
 0x3d6   : > { %4000 = vpow2.f32 %v2174_v3  ;;  %v2167_v5 = vsub.f32 %v2047_v44, %v2155_v4 }
 0x3d8   : > { %v3995_v6 = vpop.eup %3994  ;;  %v2180_v7 = vmul.f32 1.442695, %v2167_v5 }
 0x3d9   : > { %v2152_v8 = vpop.xlane.xlu1 %2151  ;;  %v2189_v9 = vsel %vm2137_vm4, %v3995_v6, 0.0  ;;  %v3997_v10 = vpop.eup %3996 }
 0x3da   : > { %4002 = vpow2.f32 %v2180_v7  ;;  %v2166_v11 = vsub.f32 %v2042_v48, %v2152_v8  ;;  %2190 = vadd.xlane.f32.xlu1 %v2189_v9  ;;  %v2186_v14 = vsel %vm2137_vm4, %v3997_v10, 0.0 }
 0x3dc   : > { %v2178_v12 = vmul.f32 1.442695, %v2166_v11  ;;  %v3999_v15 = vpop.eup %3998 }
 0x3dd   : > { %v2158_v13 = vpop.xlane.xlu1 %2157  ;;  %v2195_v22 = vsel %vm2137_vm4, %v3999_v15, 0.0 }
 0x3de   : > { %4004 = vpow2.f32 %v2178_v12  ;;  %v2168_v16 = vsub.f32 %v2129_v50, %v2158_v13  ;;  %2187 = vadd.xlane.f32.xlu1 %v2186_v14 }
 0x3e0   : > { %v4001_v17 = vpop.eup %4000  ;;  %v2182_v18 = vmul.f32 1.442695, %v2168_v16 }
 0x3e1   : > { %v2161_v19 = vpop.xlane.xlu1 %2160  ;;  %v2192_v21 = vsel %vm2137_vm4, %v4001_v17, 0.0 }
 0x3e2   : > { %4006 = vpow2.f32 %v2182_v18  ;;  %v2169_v23 = vsub.f32 %v2134_v52, %v2161_v19  ;;  %2193 = vadd.xlane.f32.xlu0 %v2192_v21  ;;  %2196 = vadd.xlane.f32.xlu1 %v2195_v22 }
 0x3e4   : > { %v4003_v25 = vpop.eup %4002  ;;  %v2184_v26 = vmul.f32 1.442695, %v2169_v23 }
 0x3e5   : > { %v2201_v27 = vsel %vm2137_vm4, %v4003_v25, 0.0 }
 0x3e6   : > { %4008 = vpow2.f32 %v2184_v26  ;;  %2202 = vadd.xlane.f32.xlu1 %v2201_v27 }
 0x3e8   : > { %v4005_v28 = vpop.eup %4004 }
 0x3e9   : > { %v2198_v29 = vsel %vm2137_vm4, %v4005_v28, 0.0 }
 0x3ea   : > { %2199 = vadd.xlane.f32.xlu0 %v2198_v29 }
 0x3ec   : > { %v4007_v30 = vpop.eup %4006 }
 0x3ed   : > { %v2204_v31 = vsel %vm2137_vm4, %v4007_v30, 0.0 }
 0x3ee   : > { %2205 = vadd.xlane.f32.xlu0 %v2204_v31 }
 0x3f0   : > { %v4009_v32 = vpop.eup %4008 }
 0x3f1   : > { %v2207_v33 = vsel %vm2137_vm4, %v4009_v32, 0.0 }
 0x3f2   : > { %2208 = vadd.xlane.f32.xlu1 %v2207_v33 }
 0x467   : > { %v2191_v34 = vpop.xlane.xlu1 %2190 }
 0x468   : > { %4010 = vrcp.f32 %v2191_v34 }
 0x46b   : > { %v2188_v35 = vpop.xlane.xlu1 %2187 }
 0x46c   : > { %4012 = vrcp.f32 %v2188_v35 }
 0x46f   : > { %v2197_v36 = vpop.xlane.xlu1 %2196  ;;  %v2194_v37 = vpop.xlane.xlu0 %2193 }
 0x470   : > { %4014 = vrcp.f32 %v2197_v36 }
 0x471   : > { %4016 = vrcp.f32 %v2194_v37 }
 0x472   : > { %v4011_v39 = vpop.eup %4010 }
 0x473   : > { %v2203_v38 = vpop.xlane.xlu1 %2202  ;;  %v2219_v43 = vmul.f32 %v4011_v39, %v3995_v6 }
 0x474   : > { %4018 = vrcp.f32 %v2203_v38 }
 0x476   : > { %v4013_v40 = vpop.eup %4012 }
 0x477   : > { %v2200_v41 = vpop.xlane.xlu0 %2199  ;;  %v2218_v42 = vmul.f32 %v4013_v40, %v3997_v10 }
 0x478   : > { %4020 = vrcp.f32 %v2200_v41 }
 0x479   : > { %3735 = vmatprep.mubr.msk.f32.mxu0 %vm2137_vm4, %v2218_v42  ;;  %v2935_v42 = vld [vmem:[%s4221_s25] sm:$0xff] }
 0x47a   : > { %v4015_v44 = vpop.eup %4014  ;;  %3736 = vmatmul.mubr.msk.f32.vlgmr.msra.gmra.mrb[16].mxu0 %vm2137_vm4, %v2219_v43  ;;  %v2936_v43 = vld [vmem:[%s4221_s25 + $0x8] sm:$0xff] }
 0x47b   : > { %v4017_v45 = vpop.eup %4016  ;;  %v2221_v46 = vmul.f32 %v4015_v44, %v3999_v15  ;;  %3936 = vmatpush3.bf16.msra.mxu0 %v4398_v20  ;;  %v2206_v48 = vpop.xlane.xlu0 %2205  ;;  %v3945_v44 = vpack.c.bf16 %v2936_v43, %v2935_v42 }
 0x47c   : > { %3938 = vmatprep.subr.bf16.mxu0 %v4403_v24  ;;  %4022 = vrcp.f32 %v2206_v48  ;;  %v2220_v49 = vmul.f32 %v4017_v45, %v4001_v17  ;;  %v2937_v45 = vld [vmem:[%s4221_s25 + $0x10] sm:$0xff] }
 0x47e   : > { %3742 = vmatprep.mubr.msk.f32.mxu0 %vm2137_vm4, %v2220_v49  ;;  %v4019_v51 = vpop.eup %4018  ;;  %v3029_v49 = vld [vmem:[%s4235_s21] sm:$0xff] }
 0x47f   : > { %3743 = vmatmul.mubr.msk.f32.vlgmr.msra.gmra.mrb[18].mxu0 %vm2137_vm4, %v2221_v46  ;;  %v2209_v50 = vpop.xlane.xlu1 %2208  ;;  %v2223_v20 = vmul.f32 %v4019_v51, %v4003_v25  ;;  %v2938_v46 = vld [vmem:[%s4221_s25 + $0x18] sm:$0xff]  ;;  %v3031_v51 = vld [vmem:[%s4235_s21 + $0x10] sm:$0xff] }
 0x480   : > { %3940 = vmatpush3.bf16.msra.mxu0 %v4403_v24  ;;  %4024 = vrcp.f32 %v2209_v50  ;;  %v856_v24 = vld [vmem:[%s4208_s18] sm:$0xff]  ;;  %v3949_v48 = vpack.c.bf16 %v2938_v46, %v2937_v45  ;;  %v3030_v50 = vld [vmem:[%s4235_s21 + $0x8] sm:$0xff] }
 0x481   : > { %3759 = vmatprep.subr.mxu0 %v856_v24  ;;  %v3426_v45 = vld [vmem:[%s744_s7] ss:$0 sm:$0xff] }
 0x482   : > { %v4021_v52 = vpop.eup %4020 }
 0x483   : > { %v2222_v53 = vmul.f32 %v4021_v52, %v4005_v28  ;;  %v3953_v52 = vpack.c.bf16 %v3030_v50, %v3029_v49  ;;  %v3427_v49 = vld [vmem:[%s747_s23] ss:$0 sm:$0xff] }
 0x485   : > { %3749 = vmatprep.mubr.msk.f32.mxu0 %vm2137_vm4, %v2222_v53  ;;  %v3032_v53 = vld [vmem:[%s4235_s21 + $0x18] sm:$0xff] }
 0x486   : > { %v4023_v54 = vpop.eup %4022  ;;  %3750 = vmatmul.mubr.msk.f32.vlgmr.msra.gmra.mrb[20].mxu0 %vm2137_vm4, %v2223_v20  ;;  %v3957_v20 = vpack.c.bf16 %v3032_v53, %v3031_v51 }
 0x487   : > { %v2224_v55 = vmul.f32 %v4023_v54, %v4007_v30  ;;  %3760 = vmatpush3.msra.mxu0 %v856_v24  ;;  %v3033_v54 = vld [vmem:[%s4235_s21 + $0x20] sm:$0xff] }
 0x488   : > { %3769 = vmatprep.subr.mxu0 %v858_v60 }
 0x489   : > { %3756 = vmatprep.mubr.msk.f32.mxu1 %vm2137_vm4, %v2224_v55  ;;  %v3034_v55 = vld [vmem:[%s4235_s21 + $0x28] sm:$0xff] }
 0x48a   : > { %v4025_v56 = vpop.eup %4024 }
 0x48b   : > { %v2225_v57 = vmul.f32 %v4025_v56, %v4009_v32  ;;  %v3961_v56 = vpack.c.bf16 %v3034_v55, %v3033_v54 }
 0x48d   : > { %3757 = vmatmul.mubr.msk.f32.vlgmr.msra.gmra.mrb[16].mxu1 %vm2137_vm4, %v2225_v57 }
 0x48e   : > { %3765 = vmatpush3.msra.mxu1 %v857_v58 }
 0x48f   : > { %3774 = vmatprep.subr.mxu1 %v859_v61 }
 0x54d   : > { %v3737_v62 = vpop.f32.mrb[16].mxu0 }
 0x54e   : > { %v2298_v63 = vpop.f32.mrb[17].mxu0 }
 0x54f   : > { %3761 = vmatprep.mubr.msk.f32.mxu0 %vm1788_vm2, %v2298_v63 }
 0x550   : > { %3762 = vmatmul.mubr.msk.f32.vlgmr.msra.gmra.mrb[22].mxu0 %vm1788_vm2, %v3737_v62 }
 0x551   : > { %3770 = vmatpush3.msra.mxu0 %v858_v60 }
 0x552   : > { %v3744_v0 = vpop.f32.mrb[18].mxu0  ;;  %3946 = vmatprep.subr.bf16.mxu0 %v3945_v44 }
 0x553   : > { %v2379_v1 = vpop.f32.mrb[19].mxu0 }
 0x554   : > { %3766 = vmatprep.mubr.msk.f32.mxu1 %vm1788_vm2, %v2379_v1 }
 0x555   : > { %3767 = vmatmul.mubr.msk.f32.vlgmr.msra.gmra.mrb[18].mxu1 %vm1788_vm2, %v3744_v0  ;;  %v3418_v0 = vld [vmem:[%s4593_s9] ss:$0 sm:$0xff] }
 0x556   : > { %3775 = vmatpush3.msra.mxu1 %v859_v61 }
 0x557   : > { %3954 = vmatprep.subr.bf16.mxu1 %v3953_v52 }
 0x559   : > { %v3751_v2 = vpop.f32.mrb[20].mxu0 }
 0x55a   : > { %v2460_v3 = vpop.f32.mrb[21].mxu0 }
 0x55b   : > { %3771 = vmatprep.mubr.msk.f32.mxu0 %vm1788_vm2, %v2460_v3 }
 0x55c   : > { %3772 = vmatmul.mubr.msk.f32.vlgmr.msra.gmra.mrb[24].mxu0 %vm1788_vm2, %v3751_v2 }
 0x55d   : > { %3948 = vmatpush3.bf16.msra.mxu0 %v3945_v44 }
 0x55e   : > { %3950 = vmatprep.subr.bf16.mxu0 %v3949_v48 }
 0x560   : > { %v3758_v4 = vpop.f32.mrb[16].mxu1 }
 0x561   : > { %v2541_v5 = vpop.f32.mrb[17].mxu1  ;;  %3952 = vmatpush3.bf16.msra.mxu0 %v3949_v48 }
 0x562   : > { %3776 = vmatprep.mubr.msk.f32.mxu1 %vm1788_vm2, %v2541_v5 }
 0x563   : > { %3777 = vmatmul.mubr.msk.f32.vlgmr.msra.gmra.mrb[20].mxu1 %vm1788_vm2, %v3758_v4  ;;  %v3419_v4 = vld [vmem:[%s4594_s1] ss:$0 sm:$0xff] }
 0x564   : > { %3956 = vmatpush3.bf16.msra.mxu1 %v3953_v52 }
 0x565   : > { %3958 = vmatprep.subr.bf16.mxu1 %v3957_v20 }
 0x568   : > { %3960 = vmatpush3.bf16.msra.mxu1 %v3957_v20 }
 0x569   : > { %3962 = vmatprep.subr.bf16.mxu1 %v3961_v56 }
 0x56c   : > { %3964 = vmatpush3.bf16.msra.mxu1 %v3961_v56 }
 0x623   : > { %v3763_v6 = vpop.f32.mrb[22].mxu0 }
 0x624   : > { %v2622_v7 = vpop.f32.mrb[23].mxu0  ;;  %v2881_v9 = vsel %vm860_vm1, %v3763_v6, 0.0 }
 0x625   : > { %v2874_v12 = vsel %vm860_vm1, %v2622_v7, 0.0 }
 0x628   : > { %v3768_v8 = vpop.f32.mrb[18].mxu1 }
 0x629   : > { %v2882_v10 = vsel %vm860_vm1, %v3768_v8, 0.0  ;;  %v2703_v11 = vpop.f32.mrb[19].mxu1 }
 0x62a   : > { %v2883_v13 = vadd.f32 %v2882_v10, %v2881_v9  ;;  %v2875_v14 = vsel %vm860_vm1, %v2703_v11, 0.0  ;;  %v3035_v9 = vld [vmem:[%s4235_s21 + $0x30] sm:$0xff]  ;;  %v3036_v10 = vld [vmem:[%s4235_s21 + $0x38] sm:$0xff]  ;;  %s4595_s21 = scalar_lea.vmem %s4558_s15, %s4186_s19 }
 0x62b   : > { %v2876_v15 = vadd.f32 %v2875_v14, %v2874_v12  ;;  %v3965_v11 = vpack.c.bf16 %v3036_v10, %v3035_v9  ;;  %v3420_v12 = vld [vmem:[%s733_s27] ss:$0 sm:$0xff] }
 0x62d   : > { %3966 = vmatprep.subr.bf16.mxu1 %v3965_v11 }
 0x62e   : > { %3968 = vmatpush3.bf16.msra.mxu1 %v3965_v11 }
 0x62f   : > { %v3773_v16 = vpop.f32.mrb[24].mxu0 }
 0x630   : > { %v2884_v17 = vsel %vm860_vm1, %v3773_v16, 0.0  ;;  %v2784_v18 = vpop.f32.mrb[25].mxu0 }
 0x631   : > { %v2885_v19 = vadd.f32 %v2884_v17, %v2883_v13  ;;  %v2877_v21 = vsel %vm860_vm1, %v2784_v18, 0.0 }
 0x632   : > { %v2878_v22 = vadd.f32 %v2877_v21, %v2876_v15 }
 0x636   : > { %v3778_v23 = vpop.f32.mrb[20].mxu1 }
 0x637   : > { %v2886_v25 = vsel %vm860_vm1, %v3778_v23, 0.0  ;;  %v2865_v26 = vpop.f32.mrb[21].mxu1 }
 0x638   : > { %v2887_v27 = vadd.f32 %v2886_v25, %v2885_v19  ;;  %v2879_v28 = vsel %vm860_vm1, %v2865_v26, 0.0  ;;  %v3423_v19 = vld [vmem:[%s4595_s21] ss:$0 sm:$0xff] }
 0x639   : > { %v2880_v29 = vadd.f32 %v2879_v28, %v2878_v22 }
 0x63a   : > { %v2889_v30 = vadd.f32 %v2887_v27, %v4292_v59 }
 0x63b   : > { %v2888_v31 = vadd.f32 %v2880_v29, %v4278_v47 }
 0x63c   : > { %v2895_v32 = vsel %vm860_vm1, %v2889_v30, 0.0 }
 0x63d   : > { %2896 = vadd.xlane.f32.xlu1 %v2895_v32  ;;  %v2892_v33 = vsel %vm860_vm1, %v2888_v31, 0.0 }
 0x63e   : > { %2893 = vadd.xlane.f32.xlu0 %v2892_v33 }
 0x6ca   : > { %v2897_v34 = vpop.xlane.xlu1 %2896 }
 0x6cb   : > { %v2900_v35 = vmul.f32 0.03125, %v2897_v34  ;;  %v2894_v36 = vpop.xlane.xlu0 %2893 }
 0x6cc   : > { %v2899_v37 = vmul.f32 0.03125, %v2894_v36 }
 0x6cd   : > { %v2902_v38 = vsub.f32 %v2889_v30, %v2900_v35 }
 0x6ce   : > { %v2901_v39 = vsub.f32 %v2888_v31, %v2899_v37 }
 0x6cf   : > { %v2904_v40 = vmul.f32 %v2902_v38, %v2902_v38 }
 0x6d0   : > { %v2903_v59 = vmul.f32 %v2901_v39, %v2901_v39 }
 0x6d1   : > { %v2908_v47 = vsel %vm860_vm1, %v2904_v40, 0.0 }
 0x6d2   : > { %2909 = vadd.xlane.f32.xlu1 %v2908_v47  ;;  %v2905_v41 = vsel %vm860_vm1, %v2903_v59, 0.0 }
 0x6d3   : > { %2906 = vadd.xlane.f32.xlu0 %v2905_v41 }
 0x75f   : > { %v2910_v57 = vpop.xlane.xlu1 %2909 }
 0x760   : > { %v2912_v24 = vmul.f32 0.03125, %v2910_v57  ;;  %v2907_v58 = vpop.xlane.xlu0 %2906 }
 0x761   : > { %v2911_v60 = vmul.f32 0.03125, %v2907_v58 }
 0x762   : > { %v2914_v61 = vadd.f32 1e-06, %v2912_v24 }
 0x763   : > { %v2913_v62 = vadd.f32 1e-06, %v2911_v60 }
 0x764   : > { %4026 = vrsqrt.f32 %v2914_v61 }
 0x765   : > { %4028 = vrsqrt.f32 %v2913_v62 }
 0x76e   : > { %v4027_v63 = vpop.eup %4026 }
 0x76f   : > { %v4029_v1 = vpop.eup %4028  ;;  %v2918_v2 = vmul.f32 %v4027_v63, %v2902_v38 }
 0x770   : > { %v2917_v3 = vmul.f32 %v4029_v1, %v2901_v39 }
 0x771   : > { %v2926_v5 = vmul.f32 %v3418_v0, %v2918_v2 }
 0x772   : > { %v2925_v6 = vmul.f32 %v3418_v0, %v2917_v3 }
 0x773   : > { %v2934_v8 = vadd.f32 %v3419_v4, %v2926_v5 }
 0x774   : > { %v2933_v7 = vadd.f32 %v3419_v4, %v2925_v6 }
 0x776   : > { %3787 = vmatprep.mubr.msk.f32.mxu0 %vm860_vm1, %v2933_v7 }
 0x777   : > { %3788 = vmatmul.mubr.msk.f32.vlgmr.msra.gmra.mrb[26].mxu0 %vm860_vm1, %v2934_v8 }
 0x84a   : > { %v3789_v13 = vpop.f32.mrb[26].mxu0 }
 0x84b   : > { %v3024_v14 = vadd.f32 %v3789_v13, %v3420_v12  ;;  %v3018_v15 = vpop.f32.mrb[27].mxu0 }
 0x84c   : > { %v3019_v16 = vadd.f32 %v3420_v12, %v3018_v15 }
 0x84d   : > { %v3028_v18 = vmax.f32 %v3024_v14, 0.0 }
 0x84e   : > { %v3027_v17 = vmax.f32 %v3019_v16, 0.0 }
 0x850   : > { %3806 = vmatprep.mubr.msk.f32.mxu1 %vm3044_vm5, %v3027_v17 }
 0x851   : > { %3807 = vmatmul.mubr.msk.f32.vlgmr.msra.gmra.mrb[22].mxu1 %vm3044_vm5, %v3028_v18 }
 0x924   : > { %v3808_v21 = vpop.f32.mrb[22].mxu1 }
 0x925   : > { %v3123_v22 = vadd.f32 %v3808_v21, %v3423_v19  ;;  %v3117_v23 = vpop.f32.mrb[23].mxu1 }
 0x926   : > { %v3118_v25 = vadd.f32 %v3423_v19, %v3117_v23 }
 0x927   : > { %v3127_v26 = vadd.f32 %v3123_v22, %v2934_v8 }
 0x928   : > { %v3126_v27 = vadd.f32 %v3118_v25, %v2933_v7 }
 0x929   : > { %v3133_v28 = vsel %vm860_vm1, %v3127_v26, 0.0 }
 0x92a   : > { %3134 = vadd.xlane.f32.xlu1 %v3133_v28  ;;  %v3130_v29 = vsel %vm860_vm1, %v3126_v27, 0.0 }
 0x92b   : > { %3131 = vadd.xlane.f32.xlu0 %v3130_v29 }
 0x9b7   : > { %v3135_v30 = vpop.xlane.xlu1 %3134 }
 0x9b8   : > { %v3137_v31 = vmul.f32 0.03125, %v3135_v30  ;;  %v3132_v32 = vpop.xlane.xlu0 %3131 }
 0x9b9   : > { %v3136_v33 = vmul.f32 0.03125, %v3132_v32 }
 0x9ba   : > { %v3139_v34 = vsub.f32 %v3127_v26, %v3137_v31 }
 0x9bb   : > { %v3138_v35 = vsub.f32 %v3126_v27, %v3136_v33 }
 0x9bc   : > { %v3141_v36 = vmul.f32 %v3139_v34, %v3139_v34 }
 0x9bd   : > { %v3140_v37 = vmul.f32 %v3138_v35, %v3138_v35 }
 0x9be   : > { %v3145_v38 = vsel %vm860_vm1, %v3141_v36, 0.0 }
 0x9bf   : > { %3146 = vadd.xlane.f32.xlu1 %v3145_v38  ;;  %v3142_v39 = vsel %vm860_vm1, %v3140_v37, 0.0 }
 0x9c0   : > { %3143 = vadd.xlane.f32.xlu0 %v3142_v39 }
 0xa4c   : > { %v3147_v40 = vpop.xlane.xlu1 %3146 }
 0xa4d   : > { %v3149_v59 = vmul.f32 0.03125, %v3147_v40  ;;  %v3144_v47 = vpop.xlane.xlu0 %3143 }
 0xa4e   : > { %v3148_v41 = vmul.f32 0.03125, %v3144_v47 }
 0xa4f   : > { %v3151_v42 = vadd.f32 1e-06, %v3149_v59 }
 0xa50   : > { %v3150_v43 = vadd.f32 1e-06, %v3148_v41 }
 0xa51   : > { %4030 = vrsqrt.f32 %v3151_v42 }
 0xa52   : > { %4032 = vrsqrt.f32 %v3150_v43 }
 0xa5b   : > { %v4031_v44 = vpop.eup %4030 }
 0xa5c   : > { %v4033_v46 = vpop.eup %4032  ;;  %v3155_v48 = vmul.f32 %v4031_v44, %v3139_v34 }
 0xa5d   : > { %v3154_v50 = vmul.f32 %v4033_v46, %v3138_v35  ;;  %3177 = sbr.rel (%p3428_p5) target bundleno = 2660 (0xa64), region = 100 }
 0xa5e   : > { %v3163_v51 = vmul.f32 %v3426_v45, %v3155_v48 }
 0xa5f   : > { %v3162_v52 = vmul.f32 %v3426_v45, %v3154_v50 }
 0xa60   : > { %v3171_v53 = vadd.f32 %v3427_v49, %v3163_v51 }
 0xa61   : > { %v3170_v20 = vadd.f32 %v3427_v49, %v3162_v52 }
 0xa62   : > { %3173 = vst.msk [vmem:[#allocation2 + $0x8] sm:$0xff] %vm860_vm1, %v3171_v53  ;;  %3179 = vst.msk [vmem:[#allocation4 + $0x8] sm:$0xff] (!%p3428_p5), %vm860_vm1, %v3171_v53 }
 0xa63   : > { %3172 = vst.msk [vmem:[#allocation2] sm:$0xff] %vm860_vm1, %v3170_v20  ;;  %3178 = vst.msk [vmem:[#allocation4] sm:$0xff] (!%p3428_p5), %vm860_vm1, %v3170_v20 }
 0xa64 PF: > { %p3973_p6 = scmp.eq.s32.totalorder %s4180_s0, 1  ;;  %s4073_s19 = smov [#allocation4]  }
 0xa65   : > { %s3186_s23 = sshll.u32 %s4073_s19, 4  ;;  %s3187_s23 = int_to_ptr.vmem [resolvable:$true] %s3186_s23 }
 0xa66   : > { %s4034_s7 = scalar_lea.vmem %s3187_s23, 256  ;;  %p4041_p10 = scmp.lt.s32.totalorder %s3187_s23, %s3187_s23 }
 0xa67   : > { %p4035_p7 = scmp.ne.s32.totalorder %s3187_s23, %s4034_s7  ;;  %p4042_p11 = scmp.lt.s32.totalorder %s4034_s7, %s4034_s7 }
 0xa69   : > { %p4036_p8 = pnand %p4035_p7, %p3973_p6  ;;  %p4043_p12 = por %p4042_p11, %p4041_p10 }
 0xa6b   : > { %p4037_p9 = pneg %p4036_p8 }
 0xa6d   : > { %p4044_p13 = pnand %p4043_p12, %p4037_p9 }
 0xa6f   : > { %4047 = shalt.err (!%p4044_p13)
}
 0xa70   : > { %s4596_s9 = sld [smem:[#allocation18_spill]] }
 0xa76   : > { %s4048_s20 = scalar_lea.hbm %s4596_s9, 256 }
 0xa77   : > { %p4049_p0 = scmp.ne.s32.totalorder %s4596_s9, %s4048_s20  ;;  %p4054_p3 = scmp.lt.u32.totalorder %s4048_s20, %s4596_s9 }
 0xa79   : > { %p4050_p1 = pnand %p4049_p0, %p3973_p6 }
 0xa7b   : > { %p4051_p2 = pneg %p4050_p1 }
 0xa7d   : > { %p4056_p4 = pnand %p4054_p3, %p4051_p2 }
 0xa7f   : > { %4059 = shalt.err (!%p4056_p4)
}
 0xa80   : > { %s4074_s2 = smov 128   ;;  %s4075_s28 = smov 8  }
 0xa81   : > { %3970 = dma.vmem_to_hbm [thread:$0]  (%p3973_p6), %s3187_s23, 256, %s4596_s9, [#allocation5], %s4074_s2, %s4074_s2, %s4075_s28  }
 0xa82   : > { %4065 = dma.done.wait (%p3973_p6), [#allocation5], 256  }
 0xa83   : > { %4067 = vsyncadd (%p3973_p6), [#allocation5], 4294967040 }
 0xa84 PF: > { %s4597_s30 = sld [smem:[#allocation7_spill]] }
 0xa8a   : > { %s31_s30 = sadd.s32 1, %s4597_s30  }
 0xa8b   : > { %p28_p5 = scmp.ge.s32.totalorder %s31_s30, 4  }
 0xa8d   :  { %30 = sbr.rel (!%p28_p5) target bundleno = 12 (0xc), region = 160 }
 0xa94   :  { %3202 = vsyncpa [#allocation5], 1 }
 0xa95   :  { %3204 = vsyncpa [#allocation5 + $0x1], 1 }

</bundles_post_ra>
